<compile_context>
chip_gen: v7x
topology: tpu7x:2x2x1
jax: 0.10.0
libtpu: 0.0.40
codegen_flags: <defaults>
</compile_context>

<pallas_src>
import math

import jax
import jax.numpy as jnp
from jax.experimental import pallas as pl
from jax.experimental.pallas import tpu as pltpu


# ----------------------------- config ---------------------------------------
VOCAB_SIZE = 64
D_MODEL = 32
NUM_HEADS = 4
GROUPS = 2
N_BLOCKS = 2
EPS = 1e-5
D_K = D_MODEL // NUM_HEADS
HEADS_PER_GROUP = NUM_HEADS // GROUPS
HIDDEN_DIM = 4 * D_MODEL
V_PAD = ((VOCAB_SIZE + 127) // 128) * 128      # lane-dense logits width

BATCH = 2
SEQ = 8


# ----------------------------- kernel helpers --------------------------------
def _rmsnorm(x, w, eps):
    ms = jnp.mean(x * x, axis=-1, keepdims=True)
    return x * jax.lax.rsqrt(ms + eps) * w


# ------------------------ fused whole-model kernel ----------------------------
def make_llama_kernel(has_cache, kprev, eps):
    def kernel(*refs):
        (x_ref, cosf_ref, sins_ref, perm_ref,
         anorm_ref, fnorm_ref, wqk_ref, bqk_ref, wv_ref, bv_ref,
         wo_ref, bo_ref, w13_ref, b13_ref, w2_ref, b2_ref,
         fnw_ref, outw_ref) = refs[:18]
        if has_cache:
            ck_ref, cv_ref = refs[18:20]
            logits_ref, nk_ref, nv_ref = refs[20:]
        else:
            logits_ref, nk_ref, nv_ref = refs[18:]

        x = x_ref[0]                               # (S, D) activations in VMEM
        S, D = x.shape
        cosf = cosf_ref[...]                       # (S, D)
        sins = sins_ref[...]                       # (S, D), sign folded in
        perm = perm_ref[...]                       # (D, D) rotate-half matrix
        inv_scale = 1.0 / math.sqrt(D_K)

        # seed the packed KV slabs with the incoming cache (if any)
        if has_cache:
            nk_ref[0, :kprev, :] = ck_ref[0]
            nv_ref[0, :kprev, :] = cv_ref[0]

        for i in range(N_BLOCKS):                  # static unroll over blocks
            # ---- attention pre-norm -----------------------------------------
            xn = _rmsnorm(x, anorm_ref[i], eps)

            # ---- RoPE on activations (rotate-half via MXU permutation) -------
            # TODO(synk): `rotary_embedding` is undefined in the source module;
            # a standard half-split RoPE over d_model is assumed here.
            xr = xn * cosf + jnp.dot(
                xn, perm, preferred_element_type=jnp.float32) * sins

            # ---- fused Q|K projection and V projection (single MXU dots) -----
            qk = jnp.dot(xr, wqk_ref[i],
                         preferred_element_type=jnp.float32) + bqk_ref[i]  # (S,2D)
            v_all = jnp.dot(xn, wv_ref[i],
                            preferred_element_type=jnp.float32) + bv_ref[i]  # (S,D)
            k_all = qk[:, D:]                                              # (S, D)

            # ---- KV cache: one lane-dense slab store per block ---------------
            off = kprev + i * S
            klen = off + S
            nk_ref[0, off:klen, :] = k_all
            nv_ref[0, off:klen, :] = v_all
            k_pref = nk_ref[0, :klen, :]            # (klen, D) valid prefix
            v_pref = nv_ref[0, :klen, :]

            # reference mask semantics: tril(ones(K, K))[:S, :K] -> col <= row
            row = jax.lax.broadcasted_iota(jnp.int32, (S, klen), 0)
            col = jax.lax.broadcasted_iota(jnp.int32, (S, klen), 1)
            allowed = col <= row

            # ---- attention; head merge folded into per-head Wo row blocks ----
            wo_i = wo_ref[i]                        # (D, D)
            y = None
            for h in range(NUM_HEADS):              # static unroll, all in VMEM
                sl = slice(h * D_K, (h + 1) * D_K)
                q_h = qk[:, sl] * inv_scale
                k_h = k_pref[:, sl]
                v_h = v_pref[:, sl]
                scores = jax.lax.dot_general(
                    q_h, k_h, (((1,), (1,)), ((), ())),
                    preferred_element_type=jnp.float32)           # (S, klen)
                scores = jnp.where(allowed, scores, -jnp.inf)
                m = jnp.max(scores, axis=-1, keepdims=True)
                e = jnp.exp(scores - m)
                p = e * pl.reciprocal(jnp.sum(e, axis=-1, keepdims=True),
                                      approx=True)
                o_h = jnp.dot(p, v_h, preferred_element_type=jnp.float32)
                contrib = jnp.dot(o_h, wo_i[sl, :],
                                  preferred_element_type=jnp.float32)
                y = contrib if y is None else y + contrib

            # ---- Wo bias + residual -------------------------------------------
            x = x + y + bo_ref[i]

            # ---- SwiGLU FFN with fused W1|W3 ----------------------------------
            xn2 = _rmsnorm(x, fnorm_ref[i], eps)
            h13 = jnp.dot(xn2, w13_ref[i],
                          preferred_element_type=jnp.float32) + b13_ref[i]  # (S,2H)
            h1 = h13[:, :HIDDEN_DIM]
            h3 = h13[:, HIDDEN_DIM:]
            g = h1 * jax.nn.sigmoid(h1) * h3
            x = x + jnp.dot(g, w2_ref[i],
                            preferred_element_type=jnp.float32) + b2_ref[i]

        # ---- final RMSNorm + lane-dense (padded) logits projection ------------
        xf = _rmsnorm(x, fnw_ref[...], eps)
        logits_ref[0] = jnp.dot(xf, outw_ref[...],
                                preferred_element_type=jnp.float32)

    return kernel


# ----------------------------- pallas wrapper ---------------------------------
def _const_spec(shape):
    return pl.BlockSpec(shape, lambda b, _n=len(shape): (0,) * _n)


def llama_pallas(x, st, final_norm_w, out_w_pad, cos_full, sin_signed, perm,
                 cache_packed):
    B, S, D = x.shape
    has_cache = cache_packed is not None
    kprev = cache_packed[0].shape[1] if has_cache else 0
    k_total = kprev + N_BLOCKS * S
    Vp = out_w_pad.shape[1]

    in_specs = [
        pl.BlockSpec((1, S, D), lambda b: (b, 0, 0)),               # x
        _const_spec((S, D)), _const_spec((S, D)), _const_spec((D, D)),
        _const_spec((N_BLOCKS, 1, D)), _const_spec((N_BLOCKS, 1, D)),
        _const_spec((N_BLOCKS, D, 2 * D)), _const_spec((N_BLOCKS, 1, 2 * D)),
        _const_spec((N_BLOCKS, D, D)), _const_spec((N_BLOCKS, 1, D)),
        _const_spec((N_BLOCKS, D, D)), _const_spec((N_BLOCKS, 1, D)),
        _const_spec((N_BLOCKS, D, 2 * HIDDEN_DIM)),
        _const_spec((N_BLOCKS, 1, 2 * HIDDEN_DIM)),
        _const_spec((N_BLOCKS, HIDDEN_DIM, D)), _const_spec((N_BLOCKS, 1, D)),
        _const_spec((1, D)), _const_spec((D, Vp)),
    ]
    args = [x, cos_full, sin_signed, perm,
            st["attn_norm_w"], st["ff_norm_w"],
            st["Wqk_w"], st["Wqk_b"], st["Wv_w"], st["Wv_b"],
            st["Wo_w"], st["Wo_b"], st["W13_w"], st["W13_b"],
            st["W2_w"], st["W2_b"],
            final_norm_w, out_w_pad]
    if has_cache:
        in_specs += [pl.BlockSpec((1, kprev, D), lambda b: (b, 0, 0))] * 2
        args += [cache_packed[0], cache_packed[1]]

    out_shape = (
        jax.ShapeDtypeStruct((B, S, Vp), jnp.float32),
        jax.ShapeDtypeStruct((B, k_total, D), jnp.float32),
        jax.ShapeDtypeStruct((B, k_total, D), jnp.float32),
    )
    out_specs = (
        pl.BlockSpec((1, S, Vp), lambda b: (b, 0, 0)),
        pl.BlockSpec((1, k_total, D), lambda b: (b, 0, 0)),
        pl.BlockSpec((1, k_total, D), lambda b: (b, 0, 0)),
    )
    return pl.pallas_call(
        make_llama_kernel(has_cache, kprev, EPS),
        out_shape=out_shape,
        grid=(B,),
        in_specs=in_specs,
        out_specs=out_specs,
        compiler_params=pltpu.CompilerParams(
            dimension_semantics=("parallel",)),
    )(*args)


# ----------------------------- model glue ------------------------------------
def rope_constants(S, D):
    half = D // 2
    pos = jnp.arange(S, dtype=jnp.float32)[:, None]
    inv_freq = 1.0 / (10000.0 ** (jnp.arange(half, dtype=jnp.float32) / half))
    ang = pos * inv_freq[None, :]
    cos = jnp.cos(ang)
    sin = jnp.sin(ang)
    cos_full = jnp.concatenate([cos, cos], axis=-1)                  # (S, D)
    sin_signed = jnp.concatenate([-sin, sin], axis=-1)               # (S, D)
    # rotate-half as a matmul: (x @ perm) == concat([x2, x1], axis=-1)
    perm = jnp.roll(jnp.eye(D, dtype=jnp.float32), half, axis=0)     # (D, D)
    return cos_full, sin_signed, perm


def llama_forward(params, tokens, kv_cache=None):
    x = jnp.take(params["embedding"], tokens, axis=0)                # (B, S, D)
    B, S, D = x.shape
    cos_full, sin_signed, perm = rope_constants(S, D)
    out_w_pad = jnp.pad(params["out_w"],
                        ((0, 0), (0, V_PAD - VOCAB_SIZE)))           # (D, 128)

    if kv_cache is not None:
        ck, cv = kv_cache                       # (B, G, HPG, kprev, D_K)
        kprev = ck.shape[3]
        pack = lambda t: t.transpose(0, 3, 1, 2, 4).reshape(B, kprev, D_MODEL)
        cache_packed = (pack(ck), pack(cv))
    else:
        cache_packed = None

    logits_p, nk, nv = llama_pallas(
        x, params["stacked"], params["final_norm_w"], out_w_pad,
        cos_full, sin_signed, perm, cache_packed)

    logits = logits_p[:, :, :VOCAB_SIZE]
    kt = nk.shape[1]
    unpack = lambda t: t.reshape(B, kt, GROUPS, HEADS_PER_GROUP, D_K
                                 ).transpose(0, 2, 3, 1, 4)
    return logits, (unpack(nk), unpack(nv))


# ----------------------------- deterministic init ----------------------------
def xavier_uniform(key, fan_in, fan_out):
    bound = math.sqrt(6.0 / (fan_in + fan_out))
    return jax.random.uniform(key, (fan_in, fan_out), jnp.float32, -bound, bound)


def linear_bias(key, fan_in, n):
    bound = 1.0 / math.sqrt(fan_in)
    return jax.random.uniform(key, (n,), jnp.float32, -bound, bound)


def init_params(key):
    keys = iter(jax.random.split(key, 4 + N_BLOCKS * 16))
    params = {
        "embedding": 0.02 * jax.random.normal(next(keys),
                                              (VOCAB_SIZE, D_MODEL), jnp.float32),
        "final_norm_w": jnp.ones((1, D_MODEL), jnp.float32),
        "out_w": xavier_uniform(next(keys), D_MODEL, VOCAB_SIZE),
    }
    blocks = []
    for _ in range(N_BLOCKS):
        wq = xavier_uniform(next(keys), D_MODEL, D_MODEL)
        bq = linear_bias(next(keys), D_MODEL, D_MODEL)
        wk = xavier_uniform(next(keys), D_MODEL, D_MODEL)
        bk = linear_bias(next(keys), D_MODEL, D_MODEL)
        wv = xavier_uniform(next(keys), D_MODEL, D_MODEL)
        bv = linear_bias(next(keys), D_MODEL, D_MODEL)
        wo = xavier_uniform(next(keys), D_MODEL, D_MODEL)
        bo = linear_bias(next(keys), D_MODEL, D_MODEL)
        w1 = xavier_uniform(next(keys), D_MODEL, HIDDEN_DIM)
        b1 = linear_bias(next(keys), D_MODEL, HIDDEN_DIM)
        w3 = xavier_uniform(next(keys), D_MODEL, HIDDEN_DIM)
        b3 = linear_bias(next(keys), D_MODEL, HIDDEN_DIM)
        w2 = xavier_uniform(next(keys), HIDDEN_DIM, D_MODEL)
        b2 = linear_bias(next(keys), HIDDEN_DIM, D_MODEL)
        blocks.append({
            "attn_norm_w": jnp.ones((1, D_MODEL), jnp.float32),
            "ff_norm_w": jnp.ones((1, D_MODEL), jnp.float32),
            # fused Q|K and W1|W3 weights for lane-dense single matmuls
            "Wqk_w": jnp.concatenate([wq, wk], axis=1),
            "Wqk_b": jnp.concatenate([bq, bk]).reshape(1, 2 * D_MODEL),
            "Wv_w": wv, "Wv_b": bv.reshape(1, D_MODEL),
            "Wo_w": wo, "Wo_b": bo.reshape(1, D_MODEL),
            "W13_w": jnp.concatenate([w1, w3], axis=1),
            "W13_b": jnp.concatenate([b1, b3]).reshape(1, 2 * HIDDEN_DIM),
            "W2_w": w2, "W2_b": b2.reshape(1, D_MODEL),
        })
    # stack all per-block weights along a leading N_BLOCKS axis so the whole
    # model's weights are a fixed set of VMEM-resident inputs to one kernel
    params["stacked"] = {k: jnp.stack([b[k] for b in blocks])
                         for k in blocks[0]}
    return params


# ----------------------------- main ------------------------------------------
if __name__ == "__main__":
    key = jax.random.PRNGKey(0)
    pkey, tkey = jax.random.split(key)
    params = init_params(pkey)
    tokens = jax.random.randint(tkey, (BATCH, SEQ), 0, VOCAB_SIZE,
                                dtype=jnp.int32)

    fwd = jax.jit(llama_forward)
    logits, kv_cache = fwd(params, tokens)
    logits = jax.block_until_ready(logits)
    kv_cache = jax.tree_util.tree_map(jax.block_until_ready, kv_cache)

    assert logits.shape == (BATCH, SEQ, VOCAB_SIZE)
    assert kv_cache[0].shape == (BATCH, GROUPS, HEADS_PER_GROUP,
                                 N_BLOCKS * SEQ, D_K)
    assert bool(jnp.all(jnp.isfinite(logits)))
    print("KERNEL_OK")
</pallas_src>

<mosaic_0001>
module attributes {stable_mosaic.version = 11 : i64} {
  func.func @kernel(%arg0: i32, %arg1: memref<1x8x32xf32, #tpu.memory_space<vmem>>, %arg2: memref<8x32xf32, #tpu.memory_space<vmem>>, %arg3: memref<8x32xf32, #tpu.memory_space<vmem>>, %arg4: memref<32x32xf32, #tpu.memory_space<vmem>>, %arg5: memref<2x1x32xf32, #tpu.memory_space<vmem>>, %arg6: memref<2x1x32xf32, #tpu.memory_space<vmem>>, %arg7: memref<2x32x64xf32, #tpu.memory_space<vmem>>, %arg8: memref<2x1x64xf32, #tpu.memory_space<vmem>>, %arg9: memref<2x32x32xf32, #tpu.memory_space<vmem>>, %arg10: memref<2x1x32xf32, #tpu.memory_space<vmem>>, %arg11: memref<2x32x32xf32, #tpu.memory_space<vmem>>, %arg12: memref<2x1x32xf32, #tpu.memory_space<vmem>>, %arg13: memref<2x32x256xf32, #tpu.memory_space<vmem>>, %arg14: memref<2x1x256xf32, #tpu.memory_space<vmem>>, %arg15: memref<2x128x32xf32, #tpu.memory_space<vmem>>, %arg16: memref<2x1x32xf32, #tpu.memory_space<vmem>>, %arg17: memref<1x32xf32, #tpu.memory_space<vmem>>, %arg18: memref<32x128xf32, #tpu.memory_space<vmem>>, %arg19: memref<1x8x128xf32, #tpu.memory_space<vmem>>, %arg20: memref<1x16x32xf32, #tpu.memory_space<vmem>>, %arg21: memref<1x16x32xf32, #tpu.memory_space<vmem>>) attributes {dimension_semantics = [#tpu.dimension_semantics<parallel>], iteration_bounds = array<i64: 2>, scalar_prefetch = 0 : i64, scratch_operands = 0 : i64, tpu.core_type = #tpu.core_type<tc>, window_params = [{transform_indices = @transform_0, window_bounds = array<i64: 1, 8, 32>}, {pipeline_mode = #tpu.pipeline_mode<synchronous>, transform_indices = @transform_1, window_bounds = array<i64: 8, 32>}, {pipeline_mode = #tpu.pipeline_mode<synchronous>, transform_indices = @transform_2, window_bounds = array<i64: 8, 32>}, {pipeline_mode = #tpu.pipeline_mode<synchronous>, transform_indices = @transform_3, window_bounds = array<i64: 32, 32>}, {pipeline_mode = #tpu.pipeline_mode<synchronous>, transform_indices = @transform_4, window_bounds = array<i64: 2, 1, 32>}, {pipeline_mode = #tpu.pipeline_mode<synchronous>, transform_indices = @transform_5, window_bounds = array<i64: 2, 1, 32>}, {pipeline_mode = #tpu.pipeline_mode<synchronous>, transform_indices = @transform_6, window_bounds = array<i64: 2, 32, 64>}, {pipeline_mode = #tpu.pipeline_mode<synchronous>, transform_indices = @transform_7, window_bounds = array<i64: 2, 1, 64>}, {pipeline_mode = #tpu.pipeline_mode<synchronous>, transform_indices = @transform_8, window_bounds = array<i64: 2, 32, 32>}, {pipeline_mode = #tpu.pipeline_mode<synchronous>, transform_indices = @transform_9, window_bounds = array<i64: 2, 1, 32>}, {pipeline_mode = #tpu.pipeline_mode<synchronous>, transform_indices = @transform_10, window_bounds = array<i64: 2, 32, 32>}, {pipeline_mode = #tpu.pipeline_mode<synchronous>, transform_indices = @transform_11, window_bounds = array<i64: 2, 1, 32>}, {pipeline_mode = #tpu.pipeline_mode<synchronous>, transform_indices = @transform_12, window_bounds = array<i64: 2, 32, 256>}, {pipeline_mode = #tpu.pipeline_mode<synchronous>, transform_indices = @transform_13, window_bounds = array<i64: 2, 1, 256>}, {pipeline_mode = #tpu.pipeline_mode<synchronous>, transform_indices = @transform_14, window_bounds = array<i64: 2, 128, 32>}, {pipeline_mode = #tpu.pipeline_mode<synchronous>, transform_indices = @transform_15, window_bounds = array<i64: 2, 1, 32>}, {pipeline_mode = #tpu.pipeline_mode<synchronous>, transform_indices = @transform_16, window_bounds = array<i64: 1, 32>}, {pipeline_mode = #tpu.pipeline_mode<synchronous>, transform_indices = @transform_17, window_bounds = array<i64: 32, 128>}, {transform_indices = @transform_18, window_bounds = array<i64: 1, 8, 128>}, {transform_indices = @transform_19, window_bounds = array<i64: 1, 16, 32>}, {transform_indices = @transform_20, window_bounds = array<i64: 1, 16, 32>}]} {
    %c0 = arith.constant 0 : index
    %c0_0 = arith.constant 0 : index
    %c0_1 = arith.constant 0 : index
    %0 = vector.load %arg1[%c0, %c0_0, %c0_1] : memref<1x8x32xf32, #tpu.memory_space<vmem>>, vector<1x8x32xf32>
    %1 = vector.shape_cast %0 : vector<1x8x32xf32> to vector<8x32xf32>
    %c0_2 = arith.constant 0 : index
    %c0_3 = arith.constant 0 : index
    %2 = vector.load %arg2[%c0_2, %c0_3] : memref<8x32xf32, #tpu.memory_space<vmem>>, vector<8x32xf32>
    %c0_4 = arith.constant 0 : index
    %c0_5 = arith.constant 0 : index
    %3 = vector.load %arg3[%c0_4, %c0_5] : memref<8x32xf32, #tpu.memory_space<vmem>>, vector<8x32xf32>
    %c0_6 = arith.constant 0 : index
    %c0_7 = arith.constant 0 : index
    %4 = vector.load %arg4[%c0_6, %c0_7] : memref<32x32xf32, #tpu.memory_space<vmem>>, vector<32x32xf32>
    %c0_8 = arith.constant 0 : index
    %c0_9 = arith.constant 0 : index
    %c0_10 = arith.constant 0 : index
    %5 = vector.load %arg5[%c0_8, %c0_9, %c0_10] : memref<2x1x32xf32, #tpu.memory_space<vmem>>, vector<1x1x32xf32>
    %6 = vector.shape_cast %5 : vector<1x1x32xf32> to vector<1x32xf32>
    %7 = arith.mulf %1, %1 : vector<8x32xf32>
    %cst = arith.constant dense<0.000000e+00> : vector<8xf32>
    %8 = vector.multi_reduction <add>, %7, %cst [1] : vector<8x32xf32> to vector<8xf32>
    %9 = vector.shape_cast %8 : vector<8xf32> to vector<8x1xf32>
    %cst_11 = arith.constant 3.200000e+01 : f32
    %10 = vector.broadcast %cst_11 : f32 to vector<8x1xf32>
    %11 = arith.divf %9, %10 : vector<8x1xf32>
    %cst_12 = arith.constant 9.99999974E-6 : f32
    %12 = vector.broadcast %cst_12 : f32 to vector<8x1xf32>
    %13 = arith.addf %11, %12 : vector<8x1xf32>
    %14 = math.rsqrt %13 : vector<8x1xf32>
    %15 = vector.broadcast %14 : vector<8x1xf32> to vector<8x32xf32>
    %16 = arith.mulf %1, %15 : vector<8x32xf32>
    %17 = vector.broadcast %6 : vector<1x32xf32> to vector<8x32xf32>
    %18 = arith.mulf %16, %17 : vector<8x32xf32>
    %19 = arith.mulf %18, %2 : vector<8x32xf32>
    %cst_13 = arith.constant dense<0.000000e+00> : vector<8x32xf32>
    %20 = tpu.matmul %18, %4, %cst_13 {dimension_numbers = #tpu.dot_dimension_numbers<[1], [0], [0], [1], [0, 0, 1, 1], [], []>} : vector<8x32xf32>, vector<32x32xf32>, vector<8x32xf32> -> vector<8x32xf32>
    %21 = arith.mulf %20, %3 : vector<8x32xf32>
    %22 = arith.addf %19, %21 : vector<8x32xf32>
    %c0_14 = arith.constant 0 : index
    %c0_15 = arith.constant 0 : index
    %c0_16 = arith.constant 0 : index
    %23 = vector.load %arg7[%c0_14, %c0_15, %c0_16] : memref<2x32x64xf32, #tpu.memory_space<vmem>>, vector<1x32x64xf32>
    %24 = vector.shape_cast %23 : vector<1x32x64xf32> to vector<32x64xf32>
    %cst_17 = arith.constant dense<0.000000e+00> : vector<8x64xf32>
    %25 = tpu.matmul %22, %24, %cst_17 {dimension_numbers = #tpu.dot_dimension_numbers<[1], [0], [0], [1], [0, 0, 1, 1], [], []>} : vector<8x32xf32>, vector<32x64xf32>, vector<8x64xf32> -> vector<8x64xf32>
    %c0_18 = arith.constant 0 : index
    %c0_19 = arith.constant 0 : index
    %c0_20 = arith.constant 0 : index
    %26 = vector.load %arg8[%c0_18, %c0_19, %c0_20] : memref<2x1x64xf32, #tpu.memory_space<vmem>>, vector<1x1x64xf32>
    %27 = vector.shape_cast %26 : vector<1x1x64xf32> to vector<1x64xf32>
    %28 = vector.broadcast %27 : vector<1x64xf32> to vector<8x64xf32>
    %29 = arith.addf %25, %28 : vector<8x64xf32>
    %c0_21 = arith.constant 0 : index
    %c0_22 = arith.constant 0 : index
    %c0_23 = arith.constant 0 : index
    %30 = vector.load %arg9[%c0_21, %c0_22, %c0_23] : memref<2x32x32xf32, #tpu.memory_space<vmem>>, vector<1x32x32xf32>
    %31 = vector.shape_cast %30 : vector<1x32x32xf32> to vector<32x32xf32>
    %cst_24 = arith.constant dense<0.000000e+00> : vector<8x32xf32>
    %32 = tpu.matmul %18, %31, %cst_24 {dimension_numbers = #tpu.dot_dimension_numbers<[1], [0], [0], [1], [0, 0, 1, 1], [], []>} : vector<8x32xf32>, vector<32x32xf32>, vector<8x32xf32> -> vector<8x32xf32>
    %c0_25 = arith.constant 0 : index
    %c0_26 = arith.constant 0 : index
    %c0_27 = arith.constant 0 : index
    %33 = vector.load %arg10[%c0_25, %c0_26, %c0_27] : memref<2x1x32xf32, #tpu.memory_space<vmem>>, vector<1x1x32xf32>
    %34 = vector.shape_cast %33 : vector<1x1x32xf32> to vector<1x32xf32>
    %35 = vector.broadcast %34 : vector<1x32xf32> to vector<8x32xf32>
    %36 = arith.addf %32, %35 : vector<8x32xf32>
    %37 = vector.extract_strided_slice %29 {offsets = [0, 32], sizes = [8, 32], strides = [1, 1]} : vector<8x64xf32> to vector<8x32xf32>
    %c0_28 = arith.constant 0 : index
    %c0_29 = arith.constant 0 : index
    %c0_30 = arith.constant 0 : index
    %38 = vector.load %arg20[%c0_28, %c0_29, %c0_30] : memref<1x16x32xf32, #tpu.memory_space<vmem>>, vector<1x8x32xf32>
    %39 = vector.shape_cast %38 : vector<1x8x32xf32> to vector<8x32xf32>
    %40 = vector.shape_cast %37 : vector<8x32xf32> to vector<1x8x32xf32>
    tpu.vector_store %arg20[%c0_28, %c0_29, %c0_30], %40 {strides = array<i32>} : memref<1x16x32xf32, #tpu.memory_space<vmem>>, vector<1x8x32xf32>,
    %c0_31 = arith.constant 0 : index
    %c0_32 = arith.constant 0 : index
    %c0_33 = arith.constant 0 : index
    %41 = vector.load %arg21[%c0_31, %c0_32, %c0_33] : memref<1x16x32xf32, #tpu.memory_space<vmem>>, vector<1x8x32xf32>
    %42 = vector.shape_cast %41 : vector<1x8x32xf32> to vector<8x32xf32>
    %43 = vector.shape_cast %36 : vector<8x32xf32> to vector<1x8x32xf32>
    tpu.vector_store %arg21[%c0_31, %c0_32, %c0_33], %43 {strides = array<i32>} : memref<1x16x32xf32, #tpu.memory_space<vmem>>, vector<1x8x32xf32>,
    %c0_34 = arith.constant 0 : index
    %c0_35 = arith.constant 0 : index
    %c0_36 = arith.constant 0 : index
    %44 = vector.load %arg20[%c0_34, %c0_35, %c0_36] : memref<1x16x32xf32, #tpu.memory_space<vmem>>, vector<1x8x32xf32>
    %45 = vector.shape_cast %44 : vector<1x8x32xf32> to vector<8x32xf32>
    %c0_37 = arith.constant 0 : index
    %c0_38 = arith.constant 0 : index
    %c0_39 = arith.constant 0 : index
    %46 = vector.load %arg21[%c0_37, %c0_38, %c0_39] : memref<1x16x32xf32, #tpu.memory_space<vmem>>, vector<1x8x32xf32>
    %47 = vector.shape_cast %46 : vector<1x8x32xf32> to vector<8x32xf32>
    %48 = tpu.iota {dimensions = array<i32: 0>} : vector<8x8xi32>
    %49 = tpu.iota {dimensions = array<i32: 1>} : vector<8x8xi32>
    %50 = arith.cmpi sle, %49, %48 : vector<8x8xi32>
    %c0_40 = arith.constant 0 : index
    %c0_41 = arith.constant 0 : index
    %c0_42 = arith.constant 0 : index
    %51 = vector.load %arg11[%c0_40, %c0_41, %c0_42] : memref<2x32x32xf32, #tpu.memory_space<vmem>>, vector<1x32x32xf32>
    %52 = vector.shape_cast %51 : vector<1x32x32xf32> to vector<32x32xf32>
    %53 = vector.extract_strided_slice %29 {offsets = [0, 0], sizes = [8, 8], strides = [1, 1]} : vector<8x64xf32> to vector<8x8xf32>
    %cst_43 = arith.constant 0.353553385 : f32
    %54 = vector.broadcast %cst_43 : f32 to vector<8x8xf32>
    %55 = arith.mulf %53, %54 : vector<8x8xf32>
    %56 = vector.extract_strided_slice %45 {offsets = [0, 0], sizes = [8, 8], strides = [1, 1]} : vector<8x32xf32> to vector<8x8xf32>
    %57 = vector.extract_strided_slice %47 {offsets = [0, 0], sizes = [8, 8], strides = [1, 1]} : vector<8x32xf32> to vector<8x8xf32>
    %cst_44 = arith.constant dense<0.000000e+00> : vector<8x8xf32>
    %58 = tpu.matmul %55, %56, %cst_44 {dimension_numbers = #tpu.dot_dimension_numbers<[1], [1], [0], [0], [0, 0, 1, 0], [], []>} : vector<8x8xf32>, vector<8x8xf32>, vector<8x8xf32> -> vector<8x8xf32>
    %cst_45 = arith.constant 0xFF800000 : f32
    %59 = vector.broadcast %cst_45 : f32 to vector<8x8xf32>
    %60 = arith.select %50, %58, %59 : vector<8x8xi1>, vector<8x8xf32>
    %cst_46 = arith.constant dense<0xFF800000> : vector<8xf32>
    %61 = vector.multi_reduction <maximumf>, %60, %cst_46 [1] : vector<8x8xf32> to vector<8xf32>
    %62 = vector.shape_cast %61 : vector<8xf32> to vector<8x1xf32>
    %63 = vector.broadcast %62 : vector<8x1xf32> to vector<8x8xf32>
    %64 = arith.subf %60, %63 : vector<8x8xf32>
    %65 = math.exp %64 : vector<8x8xf32>
    %cst_47 = arith.constant dense<0.000000e+00> : vector<8xf32>
    %66 = vector.multi_reduction <add>, %65, %cst_47 [1] : vector<8x8xf32> to vector<8xf32>
    %67 = vector.shape_cast %66 : vector<8xf32> to vector<8x1xf32>
    %68 = tpu.reciprocal %67 {approx = true} : vector<8x1xf32> -> vector<8x1xf32>
    %69 = vector.broadcast %68 : vector<8x1xf32> to vector<8x8xf32>
    %70 = arith.mulf %65, %69 : vector<8x8xf32>
    %cst_48 = arith.constant dense<0.000000e+00> : vector<8x8xf32>
    %71 = tpu.matmul %70, %57, %cst_48 {dimension_numbers = #tpu.dot_dimension_numbers<[1], [0], [0], [1], [0, 0, 1, 1], [], []>} : vector<8x8xf32>, vector<8x8xf32>, vector<8x8xf32> -> vector<8x8xf32>
    %72 = vector.extract_strided_slice %52 {offsets = [0, 0], sizes = [8, 32], strides = [1, 1]} : vector<32x32xf32> to vector<8x32xf32>
    %cst_49 = arith.constant dense<0.000000e+00> : vector<8x32xf32>
    %73 = tpu.matmul %71, %72, %cst_49 {dimension_numbers = #tpu.dot_dimension_numbers<[1], [0], [0], [1], [0, 0, 1, 1], [], []>} : vector<8x8xf32>, vector<8x32xf32>, vector<8x32xf32> -> vector<8x32xf32>
    %74 = vector.extract_strided_slice %29 {offsets = [0, 8], sizes = [8, 8], strides = [1, 1]} : vector<8x64xf32> to vector<8x8xf32>
    %cst_50 = arith.constant 0.353553385 : f32
    %75 = vector.broadcast %cst_50 : f32 to vector<8x8xf32>
    %76 = arith.mulf %74, %75 : vector<8x8xf32>
    %77 = vector.extract_strided_slice %45 {offsets = [0, 8], sizes = [8, 8], strides = [1, 1]} : vector<8x32xf32> to vector<8x8xf32>
    %78 = vector.extract_strided_slice %47 {offsets = [0, 8], sizes = [8, 8], strides = [1, 1]} : vector<8x32xf32> to vector<8x8xf32>
    %cst_51 = arith.constant dense<0.000000e+00> : vector<8x8xf32>
    %79 = tpu.matmul %76, %77, %cst_51 {dimension_numbers = #tpu.dot_dimension_numbers<[1], [1], [0], [0], [0, 0, 1, 0], [], []>} : vector<8x8xf32>, vector<8x8xf32>, vector<8x8xf32> -> vector<8x8xf32>
    %cst_52 = arith.constant 0xFF800000 : f32
    %80 = vector.broadcast %cst_52 : f32 to vector<8x8xf32>
    %81 = arith.select %50, %79, %80 : vector<8x8xi1>, vector<8x8xf32>
    %cst_53 = arith.constant dense<0xFF800000> : vector<8xf32>
    %82 = vector.multi_reduction <maximumf>, %81, %cst_53 [1] : vector<8x8xf32> to vector<8xf32>
    %83 = vector.shape_cast %82 : vector<8xf32> to vector<8x1xf32>
    %84 = vector.broadcast %83 : vector<8x1xf32> to vector<8x8xf32>
    %85 = arith.subf %81, %84 : vector<8x8xf32>
    %86 = math.exp %85 : vector<8x8xf32>
    %cst_54 = arith.constant dense<0.000000e+00> : vector<8xf32>
    %87 = vector.multi_reduction <add>, %86, %cst_54 [1] : vector<8x8xf32> to vector<8xf32>
    %88 = vector.shape_cast %87 : vector<8xf32> to vector<8x1xf32>
    %89 = tpu.reciprocal %88 {approx = true} : vector<8x1xf32> -> vector<8x1xf32>
    %90 = vector.broadcast %89 : vector<8x1xf32> to vector<8x8xf32>
    %91 = arith.mulf %86, %90 : vector<8x8xf32>
    %cst_55 = arith.constant dense<0.000000e+00> : vector<8x8xf32>
    %92 = tpu.matmul %91, %78, %cst_55 {dimension_numbers = #tpu.dot_dimension_numbers<[1], [0], [0], [1], [0, 0, 1, 1], [], []>} : vector<8x8xf32>, vector<8x8xf32>, vector<8x8xf32> -> vector<8x8xf32>
    %93 = vector.extract_strided_slice %52 {offsets = [8, 0], sizes = [8, 32], strides = [1, 1]} : vector<32x32xf32> to vector<8x32xf32>
    %cst_56 = arith.constant dense<0.000000e+00> : vector<8x32xf32>
    %94 = tpu.matmul %92, %93, %cst_56 {dimension_numbers = #tpu.dot_dimension_numbers<[1], [0], [0], [1], [0, 0, 1, 1], [], []>} : vector<8x8xf32>, vector<8x32xf32>, vector<8x32xf32> -> vector<8x32xf32>
    %95 = arith.addf %73, %94 : vector<8x32xf32>
    %96 = vector.extract_strided_slice %29 {offsets = [0, 16], sizes = [8, 8], strides = [1, 1]} : vector<8x64xf32> to vector<8x8xf32>
    %cst_57 = arith.constant 0.353553385 : f32
    %97 = vector.broadcast %cst_57 : f32 to vector<8x8xf32>
    %98 = arith.mulf %96, %97 : vector<8x8xf32>
    %99 = vector.extract_strided_slice %45 {offsets = [0, 16], sizes = [8, 8], strides = [1, 1]} : vector<8x32xf32> to vector<8x8xf32>
    %100 = vector.extract_strided_slice %47 {offsets = [0, 16], sizes = [8, 8], strides = [1, 1]} : vector<8x32xf32> to vector<8x8xf32>
    %cst_58 = arith.constant dense<0.000000e+00> : vector<8x8xf32>
    %101 = tpu.matmul %98, %99, %cst_58 {dimension_numbers = #tpu.dot_dimension_numbers<[1], [1], [0], [0], [0, 0, 1, 0], [], []>} : vector<8x8xf32>, vector<8x8xf32>, vector<8x8xf32> -> vector<8x8xf32>
    %cst_59 = arith.constant 0xFF800000 : f32
    %102 = vector.broadcast %cst_59 : f32 to vector<8x8xf32>
    %103 = arith.select %50, %101, %102 : vector<8x8xi1>, vector<8x8xf32>
    %cst_60 = arith.constant dense<0xFF800000> : vector<8xf32>
    %104 = vector.multi_reduction <maximumf>, %103, %cst_60 [1] : vector<8x8xf32> to vector<8xf32>
    %105 = vector.shape_cast %104 : vector<8xf32> to vector<8x1xf32>
    %106 = vector.broadcast %105 : vector<8x1xf32> to vector<8x8xf32>
    %107 = arith.subf %103, %106 : vector<8x8xf32>
    %108 = math.exp %107 : vector<8x8xf32>
    %cst_61 = arith.constant dense<0.000000e+00> : vector<8xf32>
    %109 = vector.multi_reduction <add>, %108, %cst_61 [1] : vector<8x8xf32> to vector<8xf32>
    %110 = vector.shape_cast %109 : vector<8xf32> to vector<8x1xf32>
    %111 = tpu.reciprocal %110 {approx = true} : vector<8x1xf32> -> vector<8x1xf32>
    %112 = vector.broadcast %111 : vector<8x1xf32> to vector<8x8xf32>
    %113 = arith.mulf %108, %112 : vector<8x8xf32>
    %cst_62 = arith.constant dense<0.000000e+00> : vector<8x8xf32>
    %114 = tpu.matmul %113, %100, %cst_62 {dimension_numbers = #tpu.dot_dimension_numbers<[1], [0], [0], [1], [0, 0, 1, 1], [], []>} : vector<8x8xf32>, vector<8x8xf32>, vector<8x8xf32> -> vector<8x8xf32>
    %115 = vector.extract_strided_slice %52 {offsets = [16, 0], sizes = [8, 32], strides = [1, 1]} : vector<32x32xf32> to vector<8x32xf32>
    %cst_63 = arith.constant dense<0.000000e+00> : vector<8x32xf32>
    %116 = tpu.matmul %114, %115, %cst_63 {dimension_numbers = #tpu.dot_dimension_numbers<[1], [0], [0], [1], [0, 0, 1, 1], [], []>} : vector<8x8xf32>, vector<8x32xf32>, vector<8x32xf32> -> vector<8x32xf32>
    %117 = arith.addf %95, %116 : vector<8x32xf32>
    %118 = vector.extract_strided_slice %29 {offsets = [0, 24], sizes = [8, 8], strides = [1, 1]} : vector<8x64xf32> to vector<8x8xf32>
    %cst_64 = arith.constant 0.353553385 : f32
    %119 = vector.broadcast %cst_64 : f32 to vector<8x8xf32>
    %120 = arith.mulf %118, %119 : vector<8x8xf32>
    %121 = vector.extract_strided_slice %45 {offsets = [0, 24], sizes = [8, 8], strides = [1, 1]} : vector<8x32xf32> to vector<8x8xf32>
    %122 = vector.extract_strided_slice %47 {offsets = [0, 24], sizes = [8, 8], strides = [1, 1]} : vector<8x32xf32> to vector<8x8xf32>
    %cst_65 = arith.constant dense<0.000000e+00> : vector<8x8xf32>
    %123 = tpu.matmul %120, %121, %cst_65 {dimension_numbers = #tpu.dot_dimension_numbers<[1], [1], [0], [0], [0, 0, 1, 0], [], []>} : vector<8x8xf32>, vector<8x8xf32>, vector<8x8xf32> -> vector<8x8xf32>
    %cst_66 = arith.constant 0xFF800000 : f32
    %124 = vector.broadcast %cst_66 : f32 to vector<8x8xf32>
    %125 = arith.select %50, %123, %124 : vector<8x8xi1>, vector<8x8xf32>
    %cst_67 = arith.constant dense<0xFF800000> : vector<8xf32>
    %126 = vector.multi_reduction <maximumf>, %125, %cst_67 [1] : vector<8x8xf32> to vector<8xf32>
    %127 = vector.shape_cast %126 : vector<8xf32> to vector<8x1xf32>
    %128 = vector.broadcast %127 : vector<8x1xf32> to vector<8x8xf32>
    %129 = arith.subf %125, %128 : vector<8x8xf32>
    %130 = math.exp %129 : vector<8x8xf32>
    %cst_68 = arith.constant dense<0.000000e+00> : vector<8xf32>
    %131 = vector.multi_reduction <add>, %130, %cst_68 [1] : vector<8x8xf32> to vector<8xf32>
    %132 = vector.shape_cast %131 : vector<8xf32> to vector<8x1xf32>
    %133 = tpu.reciprocal %132 {approx = true} : vector<8x1xf32> -> vector<8x1xf32>
    %134 = vector.broadcast %133 : vector<8x1xf32> to vector<8x8xf32>
    %135 = arith.mulf %130, %134 : vector<8x8xf32>
    %cst_69 = arith.constant dense<0.000000e+00> : vector<8x8xf32>
    %136 = tpu.matmul %135, %122, %cst_69 {dimension_numbers = #tpu.dot_dimension_numbers<[1], [0], [0], [1], [0, 0, 1, 1], [], []>} : vector<8x8xf32>, vector<8x8xf32>, vector<8x8xf32> -> vector<8x8xf32>
    %137 = vector.extract_strided_slice %52 {offsets = [24, 0], sizes = [8, 32], strides = [1, 1]} : vector<32x32xf32> to vector<8x32xf32>
    %cst_70 = arith.constant dense<0.000000e+00> : vector<8x32xf32>
    %138 = tpu.matmul %136, %137, %cst_70 {dimension_numbers = #tpu.dot_dimension_numbers<[1], [0], [0], [1], [0, 0, 1, 1], [], []>} : vector<8x8xf32>, vector<8x32xf32>, vector<8x32xf32> -> vector<8x32xf32>
    %139 = arith.addf %117, %138 : vector<8x32xf32>
    %140 = arith.addf %1, %139 : vector<8x32xf32>
    %c0_71 = arith.constant 0 : index
    %c0_72 = arith.constant 0 : index
    %c0_73 = arith.constant 0 : index
    %141 = vector.load %arg12[%c0_71, %c0_72, %c0_73] : memref<2x1x32xf32, #tpu.memory_space<vmem>>, vector<1x1x32xf32>
    %142 = vector.shape_cast %141 : vector<1x1x32xf32> to vector<1x32xf32>
    %143 = vector.broadcast %142 : vector<1x32xf32> to vector<8x32xf32>
    %144 = arith.addf %140, %143 : vector<8x32xf32>
    %c0_74 = arith.constant 0 : index
    %c0_75 = arith.constant 0 : index
    %c0_76 = arith.constant 0 : index
    %145 = vector.load %arg6[%c0_74, %c0_75, %c0_76] : memref<2x1x32xf32, #tpu.memory_space<vmem>>, vector<1x1x32xf32>
    %146 = vector.shape_cast %145 : vector<1x1x32xf32> to vector<1x32xf32>
    %147 = arith.mulf %144, %144 : vector<8x32xf32>
    %cst_77 = arith.constant dense<0.000000e+00> : vector<8xf32>
    %148 = vector.multi_reduction <add>, %147, %cst_77 [1] : vector<8x32xf32> to vector<8xf32>
    %149 = vector.shape_cast %148 : vector<8xf32> to vector<8x1xf32>
    %cst_78 = arith.constant 3.200000e+01 : f32
    %150 = vector.broadcast %cst_78 : f32 to vector<8x1xf32>
    %151 = arith.divf %149, %150 : vector<8x1xf32>
    %cst_79 = arith.constant 9.99999974E-6 : f32
    %152 = vector.broadcast %cst_79 : f32 to vector<8x1xf32>
    %153 = arith.addf %151, %152 : vector<8x1xf32>
    %154 = math.rsqrt %153 : vector<8x1xf32>
    %155 = vector.broadcast %154 : vector<8x1xf32> to vector<8x32xf32>
    %156 = arith.mulf %144, %155 : vector<8x32xf32>
    %157 = vector.broadcast %146 : vector<1x32xf32> to vector<8x32xf32>
    %158 = arith.mulf %156, %157 : vector<8x32xf32>
    %c0_80 = arith.constant 0 : index
    %c0_81 = arith.constant 0 : index
    %c0_82 = arith.constant 0 : index
    %159 = vector.load %arg13[%c0_80, %c0_81, %c0_82] : memref<2x32x256xf32, #tpu.memory_space<vmem>>, vector<1x32x256xf32>
    %160 = vector.shape_cast %159 : vector<1x32x256xf32> to vector<32x256xf32>
    %cst_83 = arith.constant dense<0.000000e+00> : vector<8x256xf32>
    %161 = tpu.matmul %158, %160, %cst_83 {dimension_numbers = #tpu.dot_dimension_numbers<[1], [0], [0], [1], [0, 0, 1, 1], [], []>} : vector<8x32xf32>, vector<32x256xf32>, vector<8x256xf32> -> vector<8x256xf32>
    %c0_84 = arith.constant 0 : index
    %c0_85 = arith.constant 0 : index
    %c0_86 = arith.constant 0 : index
    %162 = vector.load %arg14[%c0_84, %c0_85, %c0_86] : memref<2x1x256xf32, #tpu.memory_space<vmem>>, vector<1x1x256xf32>
    %163 = vector.shape_cast %162 : vector<1x1x256xf32> to vector<1x256xf32>
    %164 = vector.broadcast %163 : vector<1x256xf32> to vector<8x256xf32>
    %165 = arith.addf %161, %164 : vector<8x256xf32>
    %166 = vector.extract_strided_slice %165 {offsets = [0, 0], sizes = [8, 128], strides = [1, 1]} : vector<8x256xf32> to vector<8x128xf32>
    %167 = vector.extract_strided_slice %165 {offsets = [0, 128], sizes = [8, 128], strides = [1, 1]} : vector<8x256xf32> to vector<8x128xf32>
    %168 = arith.negf %166 : vector<8x128xf32>
    %169 = math.exp %168 : vector<8x128xf32>
    %cst_87 = arith.constant 1.000000e+00 : f32
    %170 = vector.broadcast %cst_87 : f32 to vector<8x128xf32>
    %171 = arith.addf %170, %169 : vector<8x128xf32>
    %172 = arith.divf %170, %171 : vector<8x128xf32>
    %173 = arith.mulf %166, %172 : vector<8x128xf32>
    %174 = arith.mulf %173, %167 : vector<8x128xf32>
    %c0_88 = arith.constant 0 : index
    %c0_89 = arith.constant 0 : index
    %c0_90 = arith.constant 0 : index
    %175 = vector.load %arg15[%c0_88, %c0_89, %c0_90] : memref<2x128x32xf32, #tpu.memory_space<vmem>>, vector<1x128x32xf32>
    %176 = vector.shape_cast %175 : vector<1x128x32xf32> to vector<128x32xf32>
    %cst_91 = arith.constant dense<0.000000e+00> : vector<8x32xf32>
    %177 = tpu.matmul %174, %176, %cst_91 {dimension_numbers = #tpu.dot_dimension_numbers<[1], [0], [0], [1], [0, 0, 1, 1], [], []>} : vector<8x128xf32>, vector<128x32xf32>, vector<8x32xf32> -> vector<8x32xf32>
    %178 = arith.addf %144, %177 : vector<8x32xf32>
    %c0_92 = arith.constant 0 : index
    %c0_93 = arith.constant 0 : index
    %c0_94 = arith.constant 0 : index
    %179 = vector.load %arg16[%c0_92, %c0_93, %c0_94] : memref<2x1x32xf32, #tpu.memory_space<vmem>>, vector<1x1x32xf32>
    %180 = vector.shape_cast %179 : vector<1x1x32xf32> to vector<1x32xf32>
    %181 = vector.broadcast %180 : vector<1x32xf32> to vector<8x32xf32>
    %182 = arith.addf %178, %181 : vector<8x32xf32>
    %c1 = arith.constant 1 : index
    %c0_95 = arith.constant 0 : index
    %c0_96 = arith.constant 0 : index
    %183 = vector.load %arg5[%c1, %c0_95, %c0_96] : memref<2x1x32xf32, #tpu.memory_space<vmem>>, vector<1x1x32xf32>
    %184 = vector.shape_cast %183 : vector<1x1x32xf32> to vector<1x32xf32>
    %185 = arith.mulf %182, %182 : vector<8x32xf32>
    %cst_97 = arith.constant dense<0.000000e+00> : vector<8xf32>
    %186 = vector.multi_reduction <add>, %185, %cst_97 [1] : vector<8x32xf32> to vector<8xf32>
    %187 = vector.shape_cast %186 : vector<8xf32> to vector<8x1xf32>
    %cst_98 = arith.constant 3.200000e+01 : f32
    %188 = vector.broadcast %cst_98 : f32 to vector<8x1xf32>
    %189 = arith.divf %187, %188 : vector<8x1xf32>
    %cst_99 = arith.constant 9.99999974E-6 : f32
    %190 = vector.broadcast %cst_99 : f32 to vector<8x1xf32>
    %191 = arith.addf %189, %190 : vector<8x1xf32>
    %192 = math.rsqrt %191 : vector<8x1xf32>
    %193 = vector.broadcast %192 : vector<8x1xf32> to vector<8x32xf32>
    %194 = arith.mulf %182, %193 : vector<8x32xf32>
    %195 = vector.broadcast %184 : vector<1x32xf32> to vector<8x32xf32>
    %196 = arith.mulf %194, %195 : vector<8x32xf32>
    %197 = arith.mulf %196, %2 : vector<8x32xf32>
    %cst_100 = arith.constant dense<0.000000e+00> : vector<8x32xf32>
    %198 = tpu.matmul %196, %4, %cst_100 {dimension_numbers = #tpu.dot_dimension_numbers<[1], [0], [0], [1], [0, 0, 1, 1], [], []>} : vector<8x32xf32>, vector<32x32xf32>, vector<8x32xf32> -> vector<8x32xf32>
    %199 = arith.mulf %198, %3 : vector<8x32xf32>
    %200 = arith.addf %197, %199 : vector<8x32xf32>
    %c1_101 = arith.constant 1 : index
    %c0_102 = arith.constant 0 : index
    %c0_103 = arith.constant 0 : index
    %201 = vector.load %arg7[%c1_101, %c0_102, %c0_103] : memref<2x32x64xf32, #tpu.memory_space<vmem>>, vector<1x32x64xf32>
    %202 = vector.shape_cast %201 : vector<1x32x64xf32> to vector<32x64xf32>
    %cst_104 = arith.constant dense<0.000000e+00> : vector<8x64xf32>
    %203 = tpu.matmul %200, %202, %cst_104 {dimension_numbers = #tpu.dot_dimension_numbers<[1], [0], [0], [1], [0, 0, 1, 1], [], []>} : vector<8x32xf32>, vector<32x64xf32>, vector<8x64xf32> -> vector<8x64xf32>
    %c1_105 = arith.constant 1 : index
    %c0_106 = arith.constant 0 : index
    %c0_107 = arith.constant 0 : index
    %204 = vector.load %arg8[%c1_105, %c0_106, %c0_107] : memref<2x1x64xf32, #tpu.memory_space<vmem>>, vector<1x1x64xf32>
    %205 = vector.shape_cast %204 : vector<1x1x64xf32> to vector<1x64xf32>
    %206 = vector.broadcast %205 : vector<1x64xf32> to vector<8x64xf32>
    %207 = arith.addf %203, %206 : vector<8x64xf32>
    %c1_108 = arith.constant 1 : index
    %c0_109 = arith.constant 0 : index
    %c0_110 = arith.constant 0 : index
    %208 = vector.load %arg9[%c1_108, %c0_109, %c0_110] : memref<2x32x32xf32, #tpu.memory_space<vmem>>, vector<1x32x32xf32>
    %209 = vector.shape_cast %208 : vector<1x32x32xf32> to vector<32x32xf32>
    %cst_111 = arith.constant dense<0.000000e+00> : vector<8x32xf32>
    %210 = tpu.matmul %196, %209, %cst_111 {dimension_numbers = #tpu.dot_dimension_numbers<[1], [0], [0], [1], [0, 0, 1, 1], [], []>} : vector<8x32xf32>, vector<32x32xf32>, vector<8x32xf32> -> vector<8x32xf32>
    %c1_112 = arith.constant 1 : index
    %c0_113 = arith.constant 0 : index
    %c0_114 = arith.constant 0 : index
    %211 = vector.load %arg10[%c1_112, %c0_113, %c0_114] : memref<2x1x32xf32, #tpu.memory_space<vmem>>, vector<1x1x32xf32>
    %212 = vector.shape_cast %211 : vector<1x1x32xf32> to vector<1x32xf32>
    %213 = vector.broadcast %212 : vector<1x32xf32> to vector<8x32xf32>
    %214 = arith.addf %210, %213 : vector<8x32xf32>
    %215 = vector.extract_strided_slice %207 {offsets = [0, 32], sizes = [8, 32], strides = [1, 1]} : vector<8x64xf32> to vector<8x32xf32>
    %c0_115 = arith.constant 0 : index
    %c8 = arith.constant 8 : index
    %c0_116 = arith.constant 0 : index
    %216 = vector.load %arg20[%c0_115, %c8, %c0_116] : memref<1x16x32xf32, #tpu.memory_space<vmem>>, vector<1x8x32xf32>
    %217 = vector.shape_cast %216 : vector<1x8x32xf32> to vector<8x32xf32>
    %218 = vector.shape_cast %215 : vector<8x32xf32> to vector<1x8x32xf32>
    tpu.vector_store %arg20[%c0_115, %c8, %c0_116], %218 {strides = array<i32>} : memref<1x16x32xf32, #tpu.memory_space<vmem>>, vector<1x8x32xf32>,
    %c0_117 = arith.constant 0 : index
    %c8_118 = arith.constant 8 : index
    %c0_119 = arith.constant 0 : index
    %219 = vector.load %arg21[%c0_117, %c8_118, %c0_119] : memref<1x16x32xf32, #tpu.memory_space<vmem>>, vector<1x8x32xf32>
    %220 = vector.shape_cast %219 : vector<1x8x32xf32> to vector<8x32xf32>
    %221 = vector.shape_cast %214 : vector<8x32xf32> to vector<1x8x32xf32>
    tpu.vector_store %arg21[%c0_117, %c8_118, %c0_119], %221 {strides = array<i32>} : memref<1x16x32xf32, #tpu.memory_space<vmem>>, vector<1x8x32xf32>,
    %c0_120 = arith.constant 0 : index
    %c0_121 = arith.constant 0 : index
    %c0_122 = arith.constant 0 : index
    %222 = vector.load %arg20[%c0_120, %c0_121, %c0_122] : memref<1x16x32xf32, #tpu.memory_space<vmem>>, vector<1x16x32xf32>
    %223 = vector.shape_cast %222 : vector<1x16x32xf32> to vector<16x32xf32>
    %c0_123 = arith.constant 0 : index
    %c0_124 = arith.constant 0 : index
    %c0_125 = arith.constant 0 : index
    %224 = vector.load %arg21[%c0_123, %c0_124, %c0_125] : memref<1x16x32xf32, #tpu.memory_space<vmem>>, vector<1x16x32xf32>
    %225 = vector.shape_cast %224 : vector<1x16x32xf32> to vector<16x32xf32>
    %226 = tpu.iota {dimensions = array<i32: 0>} : vector<8x16xi32>
    %227 = tpu.iota {dimensions = array<i32: 1>} : vector<8x16xi32>
    %228 = arith.cmpi sle, %227, %226 : vector<8x16xi32>
    %c1_126 = arith.constant 1 : index
    %c0_127 = arith.constant 0 : index
    %c0_128 = arith.constant 0 : index
    %229 = vector.load %arg11[%c1_126, %c0_127, %c0_128] : memref<2x32x32xf32, #tpu.memory_space<vmem>>, vector<1x32x32xf32>
    %230 = vector.shape_cast %229 : vector<1x32x32xf32> to vector<32x32xf32>
    %231 = vector.extract_strided_slice %207 {offsets = [0, 0], sizes = [8, 8], strides = [1, 1]} : vector<8x64xf32> to vector<8x8xf32>
    %cst_129 = arith.constant 0.353553385 : f32
    %232 = vector.broadcast %cst_129 : f32 to vector<8x8xf32>
    %233 = arith.mulf %231, %232 : vector<8x8xf32>
    %234 = vector.extract_strided_slice %223 {offsets = [0, 0], sizes = [16, 8], strides = [1, 1]} : vector<16x32xf32> to vector<16x8xf32>
    %235 = vector.extract_strided_slice %225 {offsets = [0, 0], sizes = [16, 8], strides = [1, 1]} : vector<16x32xf32> to vector<16x8xf32>
    %cst_130 = arith.constant dense<0.000000e+00> : vector<8x16xf32>
    %236 = tpu.matmul %233, %234, %cst_130 {dimension_numbers = #tpu.dot_dimension_numbers<[1], [1], [0], [0], [0, 0, 1, 0], [], []>} : vector<8x8xf32>, vector<16x8xf32>, vector<8x16xf32> -> vector<8x16xf32>
    %cst_131 = arith.constant 0xFF800000 : f32
    %237 = vector.broadcast %cst_131 : f32 to vector<8x16xf32>
    %238 = arith.select %228, %236, %237 : vector<8x16xi1>, vector<8x16xf32>
    %cst_132 = arith.constant dense<0xFF800000> : vector<8xf32>
    %239 = vector.multi_reduction <maximumf>, %238, %cst_132 [1] : vector<8x16xf32> to vector<8xf32>
    %240 = vector.shape_cast %239 : vector<8xf32> to vector<8x1xf32>
    %241 = vector.broadcast %240 : vector<8x1xf32> to vector<8x16xf32>
    %242 = arith.subf %238, %241 : vector<8x16xf32>
    %243 = math.exp %242 : vector<8x16xf32>
    %cst_133 = arith.constant dense<0.000000e+00> : vector<8xf32>
    %244 = vector.multi_reduction <add>, %243, %cst_133 [1] : vector<8x16xf32> to vector<8xf32>
    %245 = vector.shape_cast %244 : vector<8xf32> to vector<8x1xf32>
    %246 = tpu.reciprocal %245 {approx = true} : vector<8x1xf32> -> vector<8x1xf32>
    %247 = vector.broadcast %246 : vector<8x1xf32> to vector<8x16xf32>
    %248 = arith.mulf %243, %247 : vector<8x16xf32>
    %cst_134 = arith.constant dense<0.000000e+00> : vector<8x8xf32>
    %249 = tpu.matmul %248, %235, %cst_134 {dimension_numbers = #tpu.dot_dimension_numbers<[1], [0], [0], [1], [0, 0, 1, 1], [], []>} : vector<8x16xf32>, vector<16x8xf32>, vector<8x8xf32> -> vector<8x8xf32>
    %250 = vector.extract_strided_slice %230 {offsets = [0, 0], sizes = [8, 32], strides = [1, 1]} : vector<32x32xf32> to vector<8x32xf32>
    %cst_135 = arith.constant dense<0.000000e+00> : vector<8x32xf32>
    %251 = tpu.matmul %249, %250, %cst_135 {dimension_numbers = #tpu.dot_dimension_numbers<[1], [0], [0], [1], [0, 0, 1, 1], [], []>} : vector<8x8xf32>, vector<8x32xf32>, vector<8x32xf32> -> vector<8x32xf32>
    %252 = vector.extract_strided_slice %207 {offsets = [0, 8], sizes = [8, 8], strides = [1, 1]} : vector<8x64xf32> to vector<8x8xf32>
    %cst_136 = arith.constant 0.353553385 : f32
    %253 = vector.broadcast %cst_136 : f32 to vector<8x8xf32>
    %254 = arith.mulf %252, %253 : vector<8x8xf32>
    %255 = vector.extract_strided_slice %223 {offsets = [0, 8], sizes = [16, 8], strides = [1, 1]} : vector<16x32xf32> to vector<16x8xf32>
    %256 = vector.extract_strided_slice %225 {offsets = [0, 8], sizes = [16, 8], strides = [1, 1]} : vector<16x32xf32> to vector<16x8xf32>
    %cst_137 = arith.constant dense<0.000000e+00> : vector<8x16xf32>
    %257 = tpu.matmul %254, %255, %cst_137 {dimension_numbers = #tpu.dot_dimension_numbers<[1], [1], [0], [0], [0, 0, 1, 0], [], []>} : vector<8x8xf32>, vector<16x8xf32>, vector<8x16xf32> -> vector<8x16xf32>
    %cst_138 = arith.constant 0xFF800000 : f32
    %258 = vector.broadcast %cst_138 : f32 to vector<8x16xf32>
    %259 = arith.select %228, %257, %258 : vector<8x16xi1>, vector<8x16xf32>
    %cst_139 = arith.constant dense<0xFF800000> : vector<8xf32>
    %260 = vector.multi_reduction <maximumf>, %259, %cst_139 [1] : vector<8x16xf32> to vector<8xf32>
    %261 = vector.shape_cast %260 : vector<8xf32> to vector<8x1xf32>
    %262 = vector.broadcast %261 : vector<8x1xf32> to vector<8x16xf32>
    %263 = arith.subf %259, %262 : vector<8x16xf32>
    %264 = math.exp %263 : vector<8x16xf32>
    %cst_140 = arith.constant dense<0.000000e+00> : vector<8xf32>
    %265 = vector.multi_reduction <add>, %264, %cst_140 [1] : vector<8x16xf32> to vector<8xf32>
    %266 = vector.shape_cast %265 : vector<8xf32> to vector<8x1xf32>
    %267 = tpu.reciprocal %266 {approx = true} : vector<8x1xf32> -> vector<8x1xf32>
    %268 = vector.broadcast %267 : vector<8x1xf32> to vector<8x16xf32>
    %269 = arith.mulf %264, %268 : vector<8x16xf32>
    %cst_141 = arith.constant dense<0.000000e+00> : vector<8x8xf32>
    %270 = tpu.matmul %269, %256, %cst_141 {dimension_numbers = #tpu.dot_dimension_numbers<[1], [0], [0], [1], [0, 0, 1, 1], [], []>} : vector<8x16xf32>, vector<16x8xf32>, vector<8x8xf32> -> vector<8x8xf32>
    %271 = vector.extract_strided_slice %230 {offsets = [8, 0], sizes = [8, 32], strides = [1, 1]} : vector<32x32xf32> to vector<8x32xf32>
    %cst_142 = arith.constant dense<0.000000e+00> : vector<8x32xf32>
    %272 = tpu.matmul %270, %271, %cst_142 {dimension_numbers = #tpu.dot_dimension_numbers<[1], [0], [0], [1], [0, 0, 1, 1], [], []>} : vector<8x8xf32>, vector<8x32xf32>, vector<8x32xf32> -> vector<8x32xf32>
    %273 = arith.addf %251, %272 : vector<8x32xf32>
    %274 = vector.extract_strided_slice %207 {offsets = [0, 16], sizes = [8, 8], strides = [1, 1]} : vector<8x64xf32> to vector<8x8xf32>
    %cst_143 = arith.constant 0.353553385 : f32
    %275 = vector.broadcast %cst_143 : f32 to vector<8x8xf32>
    %276 = arith.mulf %274, %275 : vector<8x8xf32>
    %277 = vector.extract_strided_slice %223 {offsets = [0, 16], sizes = [16, 8], strides = [1, 1]} : vector<16x32xf32> to vector<16x8xf32>
    %278 = vector.extract_strided_slice %225 {offsets = [0, 16], sizes = [16, 8], strides = [1, 1]} : vector<16x32xf32> to vector<16x8xf32>
    %cst_144 = arith.constant dense<0.000000e+00> : vector<8x16xf32>
    %279 = tpu.matmul %276, %277, %cst_144 {dimension_numbers = #tpu.dot_dimension_numbers<[1], [1], [0], [0], [0, 0, 1, 0], [], []>} : vector<8x8xf32>, vector<16x8xf32>, vector<8x16xf32> -> vector<8x16xf32>
    %cst_145 = arith.constant 0xFF800000 : f32
    %280 = vector.broadcast %cst_145 : f32 to vector<8x16xf32>
    %281 = arith.select %228, %279, %280 : vector<8x16xi1>, vector<8x16xf32>
    %cst_146 = arith.constant dense<0xFF800000> : vector<8xf32>
    %282 = vector.multi_reduction <maximumf>, %281, %cst_146 [1] : vector<8x16xf32> to vector<8xf32>
    %283 = vector.shape_cast %282 : vector<8xf32> to vector<8x1xf32>
    %284 = vector.broadcast %283 : vector<8x1xf32> to vector<8x16xf32>
    %285 = arith.subf %281, %284 : vector<8x16xf32>
    %286 = math.exp %285 : vector<8x16xf32>
    %cst_147 = arith.constant dense<0.000000e+00> : vector<8xf32>
    %287 = vector.multi_reduction <add>, %286, %cst_147 [1] : vector<8x16xf32> to vector<8xf32>
    %288 = vector.shape_cast %287 : vector<8xf32> to vector<8x1xf32>
    %289 = tpu.reciprocal %288 {approx = true} : vector<8x1xf32> -> vector<8x1xf32>
    %290 = vector.broadcast %289 : vector<8x1xf32> to vector<8x16xf32>
    %291 = arith.mulf %286, %290 : vector<8x16xf32>
    %cst_148 = arith.constant dense<0.000000e+00> : vector<8x8xf32>
    %292 = tpu.matmul %291, %278, %cst_148 {dimension_numbers = #tpu.dot_dimension_numbers<[1], [0], [0], [1], [0, 0, 1, 1], [], []>} : vector<8x16xf32>, vector<16x8xf32>, vector<8x8xf32> -> vector<8x8xf32>
    %293 = vector.extract_strided_slice %230 {offsets = [16, 0], sizes = [8, 32], strides = [1, 1]} : vector<32x32xf32> to vector<8x32xf32>
    %cst_149 = arith.constant dense<0.000000e+00> : vector<8x32xf32>
    %294 = tpu.matmul %292, %293, %cst_149 {dimension_numbers = #tpu.dot_dimension_numbers<[1], [0], [0], [1], [0, 0, 1, 1], [], []>} : vector<8x8xf32>, vector<8x32xf32>, vector<8x32xf32> -> vector<8x32xf32>
    %295 = arith.addf %273, %294 : vector<8x32xf32>
    %296 = vector.extract_strided_slice %207 {offsets = [0, 24], sizes = [8, 8], strides = [1, 1]} : vector<8x64xf32> to vector<8x8xf32>
    %cst_150 = arith.constant 0.353553385 : f32
    %297 = vector.broadcast %cst_150 : f32 to vector<8x8xf32>
    %298 = arith.mulf %296, %297 : vector<8x8xf32>
    %299 = vector.extract_strided_slice %223 {offsets = [0, 24], sizes = [16, 8], strides = [1, 1]} : vector<16x32xf32> to vector<16x8xf32>
    %300 = vector.extract_strided_slice %225 {offsets = [0, 24], sizes = [16, 8], strides = [1, 1]} : vector<16x32xf32> to vector<16x8xf32>
    %cst_151 = arith.constant dense<0.000000e+00> : vector<8x16xf32>
    %301 = tpu.matmul %298, %299, %cst_151 {dimension_numbers = #tpu.dot_dimension_numbers<[1], [1], [0], [0], [0, 0, 1, 0], [], []>} : vector<8x8xf32>, vector<16x8xf32>, vector<8x16xf32> -> vector<8x16xf32>
    %cst_152 = arith.constant 0xFF800000 : f32
    %302 = vector.broadcast %cst_152 : f32 to vector<8x16xf32>
    %303 = arith.select %228, %301, %302 : vector<8x16xi1>, vector<8x16xf32>
    %cst_153 = arith.constant dense<0xFF800000> : vector<8xf32>
    %304 = vector.multi_reduction <maximumf>, %303, %cst_153 [1] : vector<8x16xf32> to vector<8xf32>
    %305 = vector.shape_cast %304 : vector<8xf32> to vector<8x1xf32>
    %306 = vector.broadcast %305 : vector<8x1xf32> to vector<8x16xf32>
    %307 = arith.subf %303, %306 : vector<8x16xf32>
    %308 = math.exp %307 : vector<8x16xf32>
    %cst_154 = arith.constant dense<0.000000e+00> : vector<8xf32>
    %309 = vector.multi_reduction <add>, %308, %cst_154 [1] : vector<8x16xf32> to vector<8xf32>
    %310 = vector.shape_cast %309 : vector<8xf32> to vector<8x1xf32>
    %311 = tpu.reciprocal %310 {approx = true} : vector<8x1xf32> -> vector<8x1xf32>
    %312 = vector.broadcast %311 : vector<8x1xf32> to vector<8x16xf32>
    %313 = arith.mulf %308, %312 : vector<8x16xf32>
    %cst_155 = arith.constant dense<0.000000e+00> : vector<8x8xf32>
    %314 = tpu.matmul %313, %300, %cst_155 {dimension_numbers = #tpu.dot_dimension_numbers<[1], [0], [0], [1], [0, 0, 1, 1], [], []>} : vector<8x16xf32>, vector<16x8xf32>, vector<8x8xf32> -> vector<8x8xf32>
    %315 = vector.extract_strided_slice %230 {offsets = [24, 0], sizes = [8, 32], strides = [1, 1]} : vector<32x32xf32> to vector<8x32xf32>
    %cst_156 = arith.constant dense<0.000000e+00> : vector<8x32xf32>
    %316 = tpu.matmul %314, %315, %cst_156 {dimension_numbers = #tpu.dot_dimension_numbers<[1], [0], [0], [1], [0, 0, 1, 1], [], []>} : vector<8x8xf32>, vector<8x32xf32>, vector<8x32xf32> -> vector<8x32xf32>
    %317 = arith.addf %295, %316 : vector<8x32xf32>
    %318 = arith.addf %182, %317 : vector<8x32xf32>
    %c1_157 = arith.constant 1 : index
    %c0_158 = arith.constant 0 : index
    %c0_159 = arith.constant 0 : index
    %319 = vector.load %arg12[%c1_157, %c0_158, %c0_159] : memref<2x1x32xf32, #tpu.memory_space<vmem>>, vector<1x1x32xf32>
    %320 = vector.shape_cast %319 : vector<1x1x32xf32> to vector<1x32xf32>
    %321 = vector.broadcast %320 : vector<1x32xf32> to vector<8x32xf32>
    %322 = arith.addf %318, %321 : vector<8x32xf32>
    %c1_160 = arith.constant 1 : index
    %c0_161 = arith.constant 0 : index
    %c0_162 = arith.constant 0 : index
    %323 = vector.load %arg6[%c1_160, %c0_161, %c0_162] : memref<2x1x32xf32, #tpu.memory_space<vmem>>, vector<1x1x32xf32>
    %324 = vector.shape_cast %323 : vector<1x1x32xf32> to vector<1x32xf32>
    %325 = arith.mulf %322, %322 : vector<8x32xf32>
    %cst_163 = arith.constant dense<0.000000e+00> : vector<8xf32>
    %326 = vector.multi_reduction <add>, %325, %cst_163 [1] : vector<8x32xf32> to vector<8xf32>
    %327 = vector.shape_cast %326 : vector<8xf32> to vector<8x1xf32>
    %cst_164 = arith.constant 3.200000e+01 : f32
    %328 = vector.broadcast %cst_164 : f32 to vector<8x1xf32>
    %329 = arith.divf %327, %328 : vector<8x1xf32>
    %cst_165 = arith.constant 9.99999974E-6 : f32
    %330 = vector.broadcast %cst_165 : f32 to vector<8x1xf32>
    %331 = arith.addf %329, %330 : vector<8x1xf32>
    %332 = math.rsqrt %331 : vector<8x1xf32>
    %333 = vector.broadcast %332 : vector<8x1xf32> to vector<8x32xf32>
    %334 = arith.mulf %322, %333 : vector<8x32xf32>
    %335 = vector.broadcast %324 : vector<1x32xf32> to vector<8x32xf32>
    %336 = arith.mulf %334, %335 : vector<8x32xf32>
    %c1_166 = arith.constant 1 : index
    %c0_167 = arith.constant 0 : index
    %c0_168 = arith.constant 0 : index
    %337 = vector.load %arg13[%c1_166, %c0_167, %c0_168] : memref<2x32x256xf32, #tpu.memory_space<vmem>>, vector<1x32x256xf32>
    %338 = vector.shape_cast %337 : vector<1x32x256xf32> to vector<32x256xf32>
    %cst_169 = arith.constant dense<0.000000e+00> : vector<8x256xf32>
    %339 = tpu.matmul %336, %338, %cst_169 {dimension_numbers = #tpu.dot_dimension_numbers<[1], [0], [0], [1], [0, 0, 1, 1], [], []>} : vector<8x32xf32>, vector<32x256xf32>, vector<8x256xf32> -> vector<8x256xf32>
    %c1_170 = arith.constant 1 : index
    %c0_171 = arith.constant 0 : index
    %c0_172 = arith.constant 0 : index
    %340 = vector.load %arg14[%c1_170, %c0_171, %c0_172] : memref<2x1x256xf32, #tpu.memory_space<vmem>>, vector<1x1x256xf32>
    %341 = vector.shape_cast %340 : vector<1x1x256xf32> to vector<1x256xf32>
    %342 = vector.broadcast %341 : vector<1x256xf32> to vector<8x256xf32>
    %343 = arith.addf %339, %342 : vector<8x256xf32>
    %344 = vector.extract_strided_slice %343 {offsets = [0, 0], sizes = [8, 128], strides = [1, 1]} : vector<8x256xf32> to vector<8x128xf32>
    %345 = vector.extract_strided_slice %343 {offsets = [0, 128], sizes = [8, 128], strides = [1, 1]} : vector<8x256xf32> to vector<8x128xf32>
    %346 = arith.negf %344 : vector<8x128xf32>
    %347 = math.exp %346 : vector<8x128xf32>
    %cst_173 = arith.constant 1.000000e+00 : f32
    %348 = vector.broadcast %cst_173 : f32 to vector<8x128xf32>
    %349 = arith.addf %348, %347 : vector<8x128xf32>
    %350 = arith.divf %348, %349 : vector<8x128xf32>
    %351 = arith.mulf %344, %350 : vector<8x128xf32>
    %352 = arith.mulf %351, %345 : vector<8x128xf32>
    %c1_174 = arith.constant 1 : index
    %c0_175 = arith.constant 0 : index
    %c0_176 = arith.constant 0 : index
    %353 = vector.load %arg15[%c1_174, %c0_175, %c0_176] : memref<2x128x32xf32, #tpu.memory_space<vmem>>, vector<1x128x32xf32>
    %354 = vector.shape_cast %353 : vector<1x128x32xf32> to vector<128x32xf32>
    %cst_177 = arith.constant dense<0.000000e+00> : vector<8x32xf32>
    %355 = tpu.matmul %352, %354, %cst_177 {dimension_numbers = #tpu.dot_dimension_numbers<[1], [0], [0], [1], [0, 0, 1, 1], [], []>} : vector<8x128xf32>, vector<128x32xf32>, vector<8x32xf32> -> vector<8x32xf32>
    %356 = arith.addf %322, %355 : vector<8x32xf32>
    %c1_178 = arith.constant 1 : index
    %c0_179 = arith.constant 0 : index
    %c0_180 = arith.constant 0 : index
    %357 = vector.load %arg16[%c1_178, %c0_179, %c0_180] : memref<2x1x32xf32, #tpu.memory_space<vmem>>, vector<1x1x32xf32>
    %358 = vector.shape_cast %357 : vector<1x1x32xf32> to vector<1x32xf32>
    %359 = vector.broadcast %358 : vector<1x32xf32> to vector<8x32xf32>
    %360 = arith.addf %356, %359 : vector<8x32xf32>
    %c0_181 = arith.constant 0 : index
    %c0_182 = arith.constant 0 : index
    %361 = vector.load %arg17[%c0_181, %c0_182] : memref<1x32xf32, #tpu.memory_space<vmem>>, vector<1x32xf32>
    %362 = arith.mulf %360, %360 : vector<8x32xf32>
    %cst_183 = arith.constant dense<0.000000e+00> : vector<8xf32>
    %363 = vector.multi_reduction <add>, %362, %cst_183 [1] : vector<8x32xf32> to vector<8xf32>
    %364 = vector.shape_cast %363 : vector<8xf32> to vector<8x1xf32>
    %cst_184 = arith.constant 3.200000e+01 : f32
    %365 = vector.broadcast %cst_184 : f32 to vector<8x1xf32>
    %366 = arith.divf %364, %365 : vector<8x1xf32>
    %cst_185 = arith.constant 9.99999974E-6 : f32
    %367 = vector.broadcast %cst_185 : f32 to vector<8x1xf32>
    %368 = arith.addf %366, %367 : vector<8x1xf32>
    %369 = math.rsqrt %368 : vector<8x1xf32>
    %370 = vector.broadcast %369 : vector<8x1xf32> to vector<8x32xf32>
    %371 = arith.mulf %360, %370 : vector<8x32xf32>
    %372 = vector.broadcast %361 : vector<1x32xf32> to vector<8x32xf32>
    %373 = arith.mulf %371, %372 : vector<8x32xf32>
    %c0_186 = arith.constant 0 : index
    %c0_187 = arith.constant 0 : index
    %374 = vector.load %arg18[%c0_186, %c0_187] : memref<32x128xf32, #tpu.memory_space<vmem>>, vector<32x128xf32>
    %cst_188 = arith.constant dense<0.000000e+00> : vector<8x128xf32>
    %375 = tpu.matmul %373, %374, %cst_188 {dimension_numbers = #tpu.dot_dimension_numbers<[1], [0], [0], [1], [0, 0, 1, 1], [], []>} : vector<8x32xf32>, vector<32x128xf32>, vector<8x128xf32> -> vector<8x128xf32>
    %c0_189 = arith.constant 0 : index
    %c0_190 = arith.constant 0 : index
    %c0_191 = arith.constant 0 : index
    %376 = vector.load %arg19[%c0_189, %c0_190, %c0_191] : memref<1x8x128xf32, #tpu.memory_space<vmem>>, vector<1x8x128xf32>
    %377 = vector.shape_cast %376 : vector<1x8x128xf32> to vector<8x128xf32>
    %378 = vector.shape_cast %375 : vector<8x128xf32> to vector<1x8x128xf32>
    tpu.vector_store %arg19[%c0_189, %c0_190, %c0_191], %378 {strides = array<i32>} : memref<1x8x128xf32, #tpu.memory_space<vmem>>, vector<1x8x128xf32>,
    return
  }
  func.func @transform_0(%arg0: i32) -> (i32, i32, i32) {
    %c0_i32 = arith.constant 0 : i32
    %c0_i32_0 = arith.constant 0 : i32
    %c0_i32_1 = arith.constant 0 : i32
    return %arg0, %c0_i32, %c0_i32_0 : i32, i32, i32
  }
  func.func @transform_1(%arg0: i32) -> (i32, i32) {
    %c0_i32 = arith.constant 0 : i32
    %c0_i32_0 = arith.constant 0 : i32
    %c0_i32_1 = arith.constant 0 : i32
    return %c0_i32, %c0_i32_0 : i32, i32
  }
  func.func @transform_2(%arg0: i32) -> (i32, i32) {
    %c0_i32 = arith.constant 0 : i32
    %c0_i32_0 = arith.constant 0 : i32
    %c0_i32_1 = arith.constant 0 : i32
    return %c0_i32, %c0_i32_0 : i32, i32
  }
  func.func @transform_3(%arg0: i32) -> (i32, i32) {
    %c0_i32 = arith.constant 0 : i32
    %c0_i32_0 = arith.constant 0 : i32
    %c0_i32_1 = arith.constant 0 : i32
    return %c0_i32, %c0_i32_0 : i32, i32
  }
  func.func @transform_4(%arg0: i32) -> (i32, i32, i32) {
    %c0_i32 = arith.constant 0 : i32
    %c0_i32_0 = arith.constant 0 : i32
    %c0_i32_1 = arith.constant 0 : i32
    %c0_i32_2 = arith.constant 0 : i32
    return %c0_i32, %c0_i32_0, %c0_i32_1 : i32, i32, i32
  }
  func.func @transform_5(%arg0: i32) -> (i32, i32, i32) {
    %c0_i32 = arith.constant 0 : i32
    %c0_i32_0 = arith.constant 0 : i32
    %c0_i32_1 = arith.constant 0 : i32
    %c0_i32_2 = arith.constant 0 : i32
    return %c0_i32, %c0_i32_0, %c0_i32_1 : i32, i32, i32
  }
  func.func @transform_6(%arg0: i32) -> (i32, i32, i32) {
    %c0_i32 = arith.constant 0 : i32
    %c0_i32_0 = arith.constant 0 : i32
    %c0_i32_1 = arith.constant 0 : i32
    %c0_i32_2 = arith.constant 0 : i32
    return %c0_i32, %c0_i32_0, %c0_i32_1 : i32, i32, i32
  }
  func.func @transform_7(%arg0: i32) -> (i32, i32, i32) {
    %c0_i32 = arith.constant 0 : i32
    %c0_i32_0 = arith.constant 0 : i32
    %c0_i32_1 = arith.constant 0 : i32
    %c0_i32_2 = arith.constant 0 : i32
    return %c0_i32, %c0_i32_0, %c0_i32_1 : i32, i32, i32
  }
  func.func @transform_8(%arg0: i32) -> (i32, i32, i32) {
    %c0_i32 = arith.constant 0 : i32
    %c0_i32_0 = arith.constant 0 : i32
    %c0_i32_1 = arith.constant 0 : i32
    %c0_i32_2 = arith.constant 0 : i32
    return %c0_i32, %c0_i32_0, %c0_i32_1 : i32, i32, i32
  }
  func.func @transform_9(%arg0: i32) -> (i32, i32, i32) {
    %c0_i32 = arith.constant 0 : i32
    %c0_i32_0 = arith.constant 0 : i32
    %c0_i32_1 = arith.constant 0 : i32
    %c0_i32_2 = arith.constant 0 : i32
    return %c0_i32, %c0_i32_0, %c0_i32_1 : i32, i32, i32
  }
  func.func @transform_10(%arg0: i32) -> (i32, i32, i32) {
    %c0_i32 = arith.constant 0 : i32
    %c0_i32_0 = arith.constant 0 : i32
    %c0_i32_1 = arith.constant 0 : i32
    %c0_i32_2 = arith.constant 0 : i32
    return %c0_i32, %c0_i32_0, %c0_i32_1 : i32, i32, i32
  }
  func.func @transform_11(%arg0: i32) -> (i32, i32, i32) {
    %c0_i32 = arith.constant 0 : i32
    %c0_i32_0 = arith.constant 0 : i32
    %c0_i32_1 = arith.constant 0 : i32
    %c0_i32_2 = arith.constant 0 : i32
    return %c0_i32, %c0_i32_0, %c0_i32_1 : i32, i32, i32
  }
  func.func @transform_12(%arg0: i32) -> (i32, i32, i32) {
    %c0_i32 = arith.constant 0 : i32
    %c0_i32_0 = arith.constant 0 : i32
    %c0_i32_1 = arith.constant 0 : i32
    %c0_i32_2 = arith.constant 0 : i32
    return %c0_i32, %c0_i32_0, %c0_i32_1 : i32, i32, i32
  }
  func.func @transform_13(%arg0: i32) -> (i32, i32, i32) {
    %c0_i32 = arith.constant 0 : i32
    %c0_i32_0 = arith.constant 0 : i32
    %c0_i32_1 = arith.constant 0 : i32
    %c0_i32_2 = arith.constant 0 : i32
    return %c0_i32, %c0_i32_0, %c0_i32_1 : i32, i32, i32
  }
  func.func @transform_14(%arg0: i32) -> (i32, i32, i32) {
    %c0_i32 = arith.constant 0 : i32
    %c0_i32_0 = arith.constant 0 : i32
    %c0_i32_1 = arith.constant 0 : i32
    %c0_i32_2 = arith.constant 0 : i32
    return %c0_i32, %c0_i32_0, %c0_i32_1 : i32, i32, i32
  }
  func.func @transform_15(%arg0: i32) -> (i32, i32, i32) {
    %c0_i32 = arith.constant 0 : i32
    %c0_i32_0 = arith.constant 0 : i32
    %c0_i32_1 = arith.constant 0 : i32
    %c0_i32_2 = arith.constant 0 : i32
    return %c0_i32, %c0_i32_0, %c0_i32_1 : i32, i32, i32
  }
  func.func @transform_16(%arg0: i32) -> (i32, i32) {
    %c0_i32 = arith.constant 0 : i32
    %c0_i32_0 = arith.constant 0 : i32
    %c0_i32_1 = arith.constant 0 : i32
    return %c0_i32, %c0_i32_0 : i32, i32
  }
  func.func @transform_17(%arg0: i32) -> (i32, i32) {
    %c0_i32 = arith.constant 0 : i32
    %c0_i32_0 = arith.constant 0 : i32
    %c0_i32_1 = arith.constant 0 : i32
    return %c0_i32, %c0_i32_0 : i32, i32
  }
  func.func @transform_18(%arg0: i32) -> (i32, i32, i32) {
    %c0_i32 = arith.constant 0 : i32
    %c0_i32_0 = arith.constant 0 : i32
    %c0_i32_1 = arith.constant 0 : i32
    return %arg0, %c0_i32, %c0_i32_0 : i32, i32, i32
  }
  func.func @transform_19(%arg0: i32) -> (i32, i32, i32) {
    %c0_i32 = arith.constant 0 : i32
    %c0_i32_0 = arith.constant 0 : i32
    %c0_i32_1 = arith.constant 0 : i32
    return %arg0, %c0_i32, %c0_i32_0 : i32, i32, i32
  }
  func.func @transform_20(%arg0: i32) -> (i32, i32, i32) {
    %c0_i32 = arith.constant 0 : i32
    %c0_i32_0 = arith.constant 0 : i32
    %c0_i32_1 = arith.constant 0 : i32
    return %arg0, %c0_i32, %c0_i32_0 : i32, i32, i32
  }
}

</mosaic_0001>

<bundles_post_ra>
// kernel: llama_forward.1
= control target key start
LH: loop header
LB: loop body
LE: loop exit
PB: predicated region body
PF: predicated region fallthrough
CT: control target
= control target key end

     0   :  { %s5534_s0 = inlined_call_operand.vmem [shape: f32[2,8,32], index: 0, kind: input, shape index: {}]   ;;  %s5535_s1 = inlined_call_operand.vmem [shape: f32[8,32], index: 1, kind: input, shape index: {}]   ;;  %s5536_s2 = inlined_call_operand.vmem [shape: f32[8,32], index: 2, kind: input, shape index: {}]   ;;  %s5537_s3 = inlined_call_operand.vmem [shape: f32[32,32], index: 3, kind: input, shape index: {}]   ;;  %s5538_s4 = inlined_call_operand.vmem [shape: f32[2,1,32], index: 4, kind: input, shape index: {}]   ;;  %s5539_s5 = inlined_call_operand.vmem [shape: f32[2,1,32], index: 5, kind: input, shape index: {}]   ;;  %s5540_s6 = inlined_call_operand.vmem [shape: f32[2,32,64], index: 6, kind: input, shape index: {}]   ;;  %s5541_s7 = inlined_call_operand.vmem [shape: f32[2,1,64], index: 7, kind: input, shape index: {}]   ;;  %s5542_s8 = inlined_call_operand.vmem [shape: f32[2,32,32], index: 8, kind: input, shape index: {}]   ;;  %s5543_s9 = inlined_call_operand.vmem [shape: f32[2,1,32], index: 9, kind: input, shape index: {}]   ;;  %s5544_s10 = inlined_call_operand.vmem [shape: f32[2,32,32], index: 10, kind: input, shape index: {}]   ;;  %s5545_s11 = inlined_call_operand.vmem [shape: f32[2,1,32], index: 11, kind: input, shape index: {}]   ;;  %s5546_s12 = inlined_call_operand.vmem [shape: f32[2,32,256], index: 12, kind: input, shape index: {}]   ;;  %s5547_s13 = inlined_call_operand.vmem [shape: f32[2,1,256], index: 13, kind: input, shape index: {}]   ;;  %s5548_s14 = inlined_call_operand.vmem [shape: f32[2,128,32], index: 14, kind: input, shape index: {}]   ;;  %s5549_s15 = inlined_call_operand.vmem [shape: f32[2,1,32], index: 15, kind: input, shape index: {}]   ;;  %s5550_s16 = inlined_call_operand.vmem [shape: f32[1,32], index: 16, kind: input, shape index: {}]   ;;  %s5551_s17 = inlined_call_operand.vmem [shape: f32[32,128], index: 17, kind: input, shape index: {}]   ;;  %s5552_s18 = inlined_call_operand.hbm [shape: f32[2,8,128], index: 18, kind: output, shape index: {0}]   ;;  %s5553_s19 = inlined_call_operand.vmem [shape: f32[2,16,32], index: 19, kind: output, shape index: {1}]   ;;  %s5554_s20 = inlined_call_operand.vmem [shape: f32[2,16,32], index: 20, kind: output, shape index: {2}]  }
   0x1   :  { %5571 = sst [smem:[#allocation11_spill]] %s5534_s0 }
   0x2   :  { %5572 = sst [smem:[#allocation12_spill]] %s5535_s1 }
   0x3   :  { %5573 = sst [smem:[#allocation13_spill]] %s5536_s2 }
   0x4   :  { %5574 = sst [smem:[#allocation14_spill]] %s5537_s3 }
   0x5   :  { %5575 = sst [smem:[#allocation15_spill]] %s5538_s4 }
   0x6   :  { %5576 = sst [smem:[#allocation16_spill]] %s5553_s19 }
   0x7   :  { %26 = vsyncpa [#allocation3], 0 }
   0x8   :  { %28 = vsyncpa [#allocation3 + $0x1], 0  ;;  %s4794_s1 = smov 0   ;;  %s4796_s22 = smov 0  }
   0x9   :  { %s4798_s23 = smov 0   ;;  %s4800_s24 = smov 0  }
   0xa LB: > { %5577 = sst [smem:[#allocation5_spill]] %s4667_s1  ;;  %s4815_s2 = sadd.s32 4294967295, %s4679_s24   ;;  %s4679_s24 = sphi %s4800_s24, %s5602_s24   ;;  %s4675_s23 = sphi %s4798_s23, %s5604_s23   ;;  %s4671_s22 = sphi %s4796_s22, %s5606_s22   ;;  %s4667_s1 = sphi %s4794_s1, %s5605_s1  }
   0xb   : > { %5578 = sst [smem:[#allocation6_spill]] %s4675_s23  ;;  %s3830_s25 = sadd.s32 4294967294, %s4679_s24  }
   0xc   : > { %5579 = sst [smem:[#allocation7_spill]] %s4679_s24  ;;  %s4819_s3 = sadd.s32 1, %s4679_s24  }
   0xd   : > { %5580 = sst [smem:[#allocation8_spill]] %s4819_s3  ;;  %s424_s26 = sadd.s32 1, %s4675_s23 }
   0xe   : > { %s421_s27 = ssub.s32 %s4679_s24, %s4819_s3  ;;  %p434_p0 = scmp.ne.s32.totalorder %s4675_s23, %s4671_s22 }
   0xf   : > { %p422_p1 = scmp.eq.s32.totalorder %s421_s27, 0  ;;  %p435_p2 = scmp.eq.s32.totalorder %s4815_s2, 1 }
  0x10   : > { %p440_p3 = scmp.ne.s32.totalorder %s4671_s22, %s4667_s1  ;;  %p441_p4 = scmp.eq.s32.totalorder %s3830_s25, 1 }
  0x11   : > { %s4830_s28 = scalar_select %p422_p1, %s4675_s23, %s424_s26  }
  0x12   : > { %p4832_p5 = por %p435_p2, %p434_p0  ;;  %p4836_p6 = por %p441_p4, %p440_p3 }
  0x13   : > { %5581 = sst [smem:[#allocation9_spill]] %s4830_s28  ;;  %p3833_p7 = scmp.ge.s32.totalorder %s4679_s24, 1 }
  0x14   : > { %s5583_s29 = scalar_select %p4836_p6, 1, 0 }
  0x15   : > { %p569_p8 = scmp.lt.s32.totalorder %s4679_s24, 3 }
  0x16   : > { %5584 = sst [smem:[#allocation10_spill]] %s5583_s29 }
  0x17   : > { %p570_p9 = pnand %p3833_p7, %p569_p8 }
  0x18   : > { %p636_p10 = scmp.lt.s32.totalorder (!%p570_p9), %s4815_s2, 1  ;;  %s5585_s26 = sld [smem:[#allocation11_spill]] (!%p570_p9)  ;;  %vm659_vm0 = vcmask (!%p570_p9), 261120   ;;  %v4681_v6 = vmov (!%p570_p9), 0.0|0.0   ;;  %vm4682_vm1 = vmmov (!%p570_p9), 0   ;;  %v4683_v9 = vmov (!%p570_p9), 0.0  }
  0x19   : > { %573 = sbr.rel (%p570_p9) target bundleno = 7923 (0x1ef3), region = 92  ;;  %s5586_s3 = sld [smem:[#allocation14_spill]] (!%p570_p9)  ;;  %4357 = vmatprep.subr.bf16.mxu0 (!%p570_p9), %v4681_v6  ;;  %4082 = vmatprep.mubr.msk.f32.mxu0 (!%p570_p9), %vm4682_vm1, %v4683_v9  ;;  %v751_v14 = vld [vmem:[%s5540_s6] sm:$0xff] (!%p570_p9)  ;;  %v752_v15 = vld [vmem:[%s5540_s6 + $0x8] sm:$0xff] (!%p570_p9)  ;;  %v753_v21 = vld [vmem:[%s5540_s6 + $0x10] sm:$0xff] (!%p570_p9)  ;;  %vm934_vm2 = vcmask (!%p570_p9), 64512   ;;  %v924_v51 = vlaneseq (!%p570_p9) }
  0x1a   : > { %4107 = vmatprep.subr.mxu1 (!%p570_p9), %v4683_v9  ;;  %4109 = vmatprep.mubr.msk.f32.mxu1 (!%p570_p9), %vm4682_vm1, %v4683_v9  ;;  %v4364_v19 = vpack.c.bf16 (!%p570_p9), %v752_v15, %v751_v14  ;;  %v754_v22 = vld [vmem:[%s5540_s6 + $0x18] sm:$0xff] (!%p570_p9)  ;;  %s5588_s28 = sld [smem:[#allocation12_spill]] (!%p570_p9)  ;;  %v835_v26 = vld [vmem:[%s5542_s8] sm:$0xff] (!%p570_p9)  ;;  %v836_v27 = vld [vmem:[%s5542_s8 + $0x8] sm:$0xff] (!%p570_p9)  ;;  %s5570_s21 = smov (!%p570_p9), 96   ;;  %vm2469_vm5 = vcmask (!%p570_p9), 130048  }
  0x1b   : > { %v4367_v23 = vpack.c.bf16 (!%p570_p9), %v754_v22, %v753_v21  ;;  %v4370_v32 = vpack.c.bf16 (!%p570_p9), %v836_v27, %v835_v26  ;;  %v837_v34 = vld [vmem:[%s5542_s8 + $0x10] sm:$0xff] (!%p570_p9)  ;;  %v838_v35 = vld [vmem:[%s5542_s8 + $0x18] sm:$0xff] (!%p570_p9)  ;;  %v3842_v37 = vld [vmem:[%s5541_s7] ss:$0 sm:$0xff] (!%p570_p9)  ;;  %s5590_s19 = sld [smem:[#allocation16_spill]] (!%p570_p9)  ;;  %v4982_v52 = vshrl.u32 (!%p570_p9), %v924_v51, 7 }
  0x1c   : > { %v4373_v36 = vpack.c.bf16 (!%p570_p9), %v838_v35, %v837_v34  ;;  %v3844_v41 = vld [vmem:[%s5543_s9] ss:$0 sm:$0xff] (!%p570_p9)  ;;  %v927_v53 = vand.u32 (!%p570_p9), 127, %v924_v51  ;;  %s5593_s24 = smov (!%p570_p9), 96   ;;  %vm5251_vm4 = vmpackc.low (!%p570_p9), %vm934_vm2, %vm934_vm2  ;;  %s619_s25 = sand.u32 (!%p570_p9), 1, %s4671_s22  }
  0x1d   : > { %v929_v22 = vld [vmem:[%s5544_s10] sm:$0xff] (!%p570_p9)  ;;  %s3834_s1 = sshll.u32 (!%p570_p9), %s619_s25, 3 }
  0x1e   : > { %vm4985_vm3 = vcmp.le.s32.totalorder (!%p570_p9), %v927_v53, %v4982_v52 }
  0x1f   : > { %v653_v3 = vld [vmem:[%s5586_s3] sm:$0xff] (!%p570_p9)  ;;  %v654_v4 = vld [vmem:[%s5586_s3 + $0x8] sm:$0xff] (!%p570_p9)  ;;  %v655_v5 = vld [vmem:[%s5586_s3 + $0x10] sm:$0xff] (!%p570_p9) }
  0x20   : > { %s4844_s30 = scalar_select %p636_p10, %s4815_s2, 1  ;;  %v4865_v7 = vpack.c.bf16 %v654_v4, %v653_v3  ;;  %v656_v8 = vld [vmem:[%s5586_s3 + $0x18] sm:$0xff]  ;;  %v4905_v24 = vld [vmem:[%s5588_s28] sm:$0xff] }
  0x21   : > { %v4876_v10 = vpack.c.bf16 %v656_v8, %v655_v5  ;;  %s5589_s3 = sld [smem:[#allocation13_spill]]  ;;  %s5564_s28 = smov 104  }
  0x22   : > { %s3835_s0 = sshll.u32 %s4844_s30, 3  ;;  %4359 = vmatpush3.bf16.msra.mxu0 %v4865_v7 }
  0x23   : > { %s639_s27 = scalar_lea.vmem %s5585_s26, %s3835_s0  ;;  %4360 = vmatprep.subr.bf16.mxu0 %v4681_v6  ;;  %s3947_s0 = sshll.u32 %s4844_s30, 4 }
  0x24   : > { %v4850_v0 = vld [vmem:[%s639_s27] sm:$0xff]  ;;  %s5587_s27 = sld [smem:[#allocation15_spill]]  ;;  %s4952_s30 = scalar_lea.vmem %s5590_s19, %s3947_s0 }
  0x25   : > { %v658_v1 = vmul.f32 %v4850_v0, %v4850_v0  ;;  %s5568_s26 = smov 120  }
  0x26   : > { %4362 = vmatpush3.bf16.msra.mxu0 %v4876_v10 }
  0x27   : > { %v660_v2 = vsel %vm659_vm0, %v658_v1, 0.0  ;;  %4363 = vmatprep.subr.bf16.mxu0 %v4681_v6  ;;  %v4910_v25 = vld [vmem:[%s5589_s3] sm:$0xff]  ;;  %s4945_s3 = scalar_lea.vmem %s5554_s20, %s3947_s0  ;;  %s5566_s0 = smov 112  }
  0x28   : > { %661 = vadd.xlane.f32.xlu0 %v660_v2 }
  0x2a   : > { %v3840_v17 = vld [vmem:[%s5587_s27] ss:$0 sm:$0xff] }
  0xb5   : > { %v662_v11 = vpop.xlane.xlu0 %661 }
  0xb6   : > { %v664_v12 = vmul.f32 0.03125, %v662_v11 }
  0xb8   : > { %v665_v13 = vadd.f32 1e-05, %v664_v12 }
  0xba   : > { %4567 = vrsqrt.f32 %v665_v13 }
  0xc4   : > { %v4568_v16 = vpop.eup %4567 }
  0xc5   : > { %v667_v18 = vmul.f32 %v4568_v16, %v4850_v0 }
  0xc7   : > { %v674_v20 = vmul.f32 %v3840_v17, %v667_v18  ;;  %v930_v17 = vld [vmem:[%s5544_s10 + $0x8] sm:$0xff] }
  0xc9   : > { %4083 = vmatmul.mubr.msk.f32.vlgmr.msra.gmra.mrb[0].mxu0 %vm659_vm0, %v674_v20  ;;  %v675_v29 = vmul.f32 %v674_v20, %v4905_v24 }
  0xca   : > { %4365 = vmatpush3.bf16.msra.mxu0 %v4364_v19  ;;  %4093 = vmatprep.mubr.msk.f32.mxu0 %vm4682_vm1, %v4683_v9 }
  0xcb   : > { %4366 = vmatprep.subr.bf16.mxu0 %v4681_v6 }
  0xce   : > { %4368 = vmatpush3.bf16.msra.mxu0 %v4367_v23 }
  0xcf   : > { %4369 = vmatprep.subr.bf16.mxu0 %v4681_v6 }
 0x19c   : > { %v745_v28 = vpop.f32.mrb[0].mxu0 }
 0x19d   : > { %v749_v30 = vmul.f32 %v745_v28, %v4910_v25  ;;  %v4084_v31 = vpop.f32.mrb[1].mxu0 }
 0x19f   : > { %v750_v33 = vadd.f32 %v749_v30, %v675_v29 }
 0x1a1   : > { %4094 = vmatmul.mubr.msk.f32.vlgmr.msra.gmra.mrb[2].mxu0 %vm659_vm0, %v750_v33 }
 0x1a2   : > { %4371 = vmatpush3.bf16.msra.mxu0 %v4370_v32  ;;  %4104 = vmatprep.mubr.msk.f32.mxu0 %vm4682_vm1, %v4683_v9 }
 0x1a3   : > { %4372 = vmatprep.subr.bf16.mxu0 %v4681_v6 }
 0x1a6   : > { %4374 = vmatpush3.bf16.msra.mxu0 %v4373_v36 }
 0x1a7   : > { %4117 = vmatprep.subr.mxu0 %v4683_v9 }
 0x1a9   : > { %4105 = vmatmul.mubr.msk.f32.vlgmr.msra.gmra.mrb[4].mxu0 %vm659_vm0, %v674_v20 }
 0x1aa   : > { %4119 = vmatprep.mubr.msk.f32.mxu0 %vm4682_vm1, %v4683_v9 }
 0x274   : > { %v831_v38 = vpop.f32.mrb[2].mxu0 }
 0x275   : > { %v832_v39 = vadd.f32 %v3842_v37, %v831_v38  ;;  %v4095_v40 = vpop.f32.mrb[3].mxu0 }
 0x277   : > { %917 = vrot.lane.b32.xlu0 %v832_v39, %s5570_s21  ;;  %v4963_v47 = vmul.f32 0.35355338, %v832_v39 }
 0x27c   : > { %v912_v42 = vpop.f32.mrb[4].mxu0 }
 0x27d   : > { %v913_v43 = vadd.f32 %v3844_v41, %v912_v42  ;;  %v4106_v44 = vpop.f32.mrb[5].mxu0 }
 0x27f   : > { %921 = vst.msk [vmem:[%s4945_s3] sm:$0xff] %vm659_vm0, %v913_v43 }
 0x286   : > { %v4969_v48 = vld [vmem:[%s4945_s3] sm:$0xff] }
 0x2e9   : > { %v918_v45 = vpop.permute.xlu0 %917 }
 0x2ea   : > { %920 = vst.msk [vmem:[%s4952_s30] sm:$0xff] %vm659_vm0, %v918_v45 }
 0x2f1   : > { %v4957_v46 = vld [vmem:[%s4952_s30] sm:$0xff] }
 0x2f2   : > { %1098 = vrot.lane.b32.xlu1 %v4957_v46, %s5568_s26  ;;  %4108 = vmatpush3.xpose.msk.msra.mxu1 %vm934_vm2, %v4957_v46 }
 0x2f3   : > { %4112 = vmatprep.subr.mxu1 %v4683_v9 }
 0x2f5   : > { %4110 = vmatmul.mubr.msk.f32.vlgmr.msra.gmra.mrb[0].mxu1 %vm934_vm2, %v4963_v47 }
 0x2f6   : > { %1096 = vrot.lane.b32.xlu1 %v4963_v47, %s5568_s26  ;;  %4113 = vmatpush3.msra.mxu1 %v4969_v48 }
 0x2f7   : > { %4114 = vmatprep.mubr.msk.f32.mxu1 %vm4682_vm1, %v4683_v9  ;;  %4122 = vmatprep.subr.mxu1 %v4683_v9 }
 0x364   : > { %v1099_v49 = vpop.permute.xlu1 %1098 }
 0x365   : > { %4118 = vmatpush3.xpose.msk.msra.mxu0 %vm934_vm2, %v1099_v49 }
 0x366   : > { %4127 = vmatprep.subr.mxu0 %v4683_v9 }
 0x368   : > { %v1097_v50 = vpop.permute.xlu1 %1096 }
 0x369   : > { %4120 = vmatmul.mubr.msk.f32.vlgmr.msra.gmra.mrb[6].mxu0 %vm934_vm2, %v1097_v50 }
 0x36a   : > { %4129 = vmatprep.mubr.msk.f32.mxu0 %vm4682_vm1, %v4683_v9  ;;  %4128 = vmatpush3.msra.mxu0 %v930_v17 }
 0x36b   : > { %4137 = vmatprep.subr.mxu0 %v4683_v9 }
 0x3c8   : > { %v1007_v55 = vpop.f32.mrb[0].mxu1 }
 0x3c9   : > { %v1011_v56 = vsel %vm4985_vm3, %v1007_v55, -inf  ;;  %v4111_v57 = vpop.f32.mrb[1].mxu1  ;;  %v931_v55 = vld [vmem:[%s5544_s10 + $0x10] sm:$0xff] }
 0x3ca   : > { %v1012_v58 = vsel %vm934_vm2, %v1011_v56, -inf }
 0x3cb   : > { %1013 = vmax.xlane.f32.xlu1 %v1012_v58 }
 0x43c   : > { %v1170_v59 = vpop.f32.mrb[6].mxu0 }
 0x43d   : > { %v1174_v60 = vsel %vm4985_vm3, %v1170_v59, -inf  ;;  %v4121_v61 = vpop.f32.mrb[7].mxu0 }
 0x43e   : > { %v1175_v62 = vsel %vm934_vm2, %v1174_v60, -inf }
 0x43f   : > { %1176 = vmax.xlane.f32.xlu0 %v1175_v62 }
 0x455   : > { %1411 = vrot.lane.b32.xlu0 %v4957_v46, %s5566_s0 }
 0x458   : > { %v1014_v63 = vpop.xlane.xlu1 %1013 }
 0x459   : > { %v1015_v1 = vsub.f32 %v1011_v56, %v1014_v63 }
 0x45b   : > { %v1016_v2 = vmul.f32 1.442695, %v1015_v1 }
 0x45d   : > { %4569 = vpow2.f32 %v1016_v2 }
 0x467   : > { %v4570_v3 = vpop.eup %4569 }
 0x468   : > { %v1018_v4 = vsel %vm934_vm2, %v4570_v3, 0.0 }
 0x469   : > { %1019 = vadd.xlane.f32.xlu1 %v1018_v4  ;;  %v932_v4 = vld [vmem:[%s5544_s10 + $0x18] sm:$0xff] }
 0x4cc   : > { %v1177_v5 = vpop.xlane.xlu0 %1176 }
 0x4cd   : > { %v1178_v8 = vsub.f32 %v1174_v60, %v1177_v5 }
 0x4cf   : > { %v1179_v11 = vmul.f32 1.442695, %v1178_v8 }
 0x4d0   : > { %v1412_v28 = vpop.permute.xlu0 %1411 }
 0x4d1   : > { %4571 = vpow2.f32 %v1179_v11 }
 0x4db   : > { %v4572_v12 = vpop.eup %4571 }
 0x4dc   : > { %v1181_v13 = vsel %vm934_vm2, %v4572_v12, 0.0 }
 0x4dd   : > { %1182 = vadd.xlane.f32.xlu1 %v1181_v13 }
 0x4ee   : > { %1187 = vrot.lane.b32.xlu1 %v4969_v48, %s5568_s26  ;;  %s5597_s26 = smov 112  }
 0x4f2   : > { %1409 = vrot.lane.b32.xlu1 %v4963_v47, %s5566_s0 }
 0x4f6   : > { %v1020_v14 = vpop.xlane.xlu1 %1019 }
 0x4f7   : > { %4573 = vrcp.f32 %v1020_v14 }
 0x501   : > { %v4574_v15 = vpop.eup %4573 }
 0x502   : > { %v1022_v16 = vmul.f32 %v4574_v15, %v4570_v3 }
 0x504   : > { %4115 = vmatmul.mubr.msk.f32.vlgmr.msra.gmra.mrb[2].mxu1 %vm934_vm2, %v1022_v16 }
 0x505   : > { %4124 = vmatprep.mubr.msk.f32.mxu1 %vm4682_vm1, %v4683_v9 }
 0x56a   : > { %v1183_v18 = vpop.xlane.xlu1 %1182 }
 0x56b   : > { %4575 = vrcp.f32 %v1183_v18 }
 0x56e   : > { %v1188_v19 = vpop.permute.xlu1 %1187 }
 0x56f   : > { %4123 = vmatpush3.msra.mxu1 %v1188_v19 }
 0x570   : > { %4132 = vmatprep.subr.mxu1 %v4683_v9 }
 0x572   : > { %v1410_v30 = vpop.permute.xlu1 %1409 }
 0x575   : > { %v4576_v20 = vpop.eup %4575 }
 0x576   : > { %v1185_v21 = vmul.f32 %v4576_v20, %v4572_v12 }
 0x578   : > { %4125 = vmatmul.mubr.msk.f32.vlgmr.msra.gmra.mrb[4].mxu1 %vm934_vm2, %v1185_v21  ;;  %v3862_v21 = vld [vmem:[%s5545_s11] ss:$0 sm:$0xff] }
 0x579   : > { %4133 = vmatpush3.msra.mxu1 %v929_v22  ;;  %4134 = vmatprep.mubr.msk.f32.mxu1 %vm4682_vm1, %v4683_v9 }
 0x57a   : > { %4142 = vmatprep.subr.mxu1 %v4683_v9 }
 0x5d7   : > { %v1092_v23 = vpop.f32.mrb[2].mxu1 }
 0x5d8   : > { %v4116_v26 = vpop.f32.mrb[3].mxu1  ;;  %4135 = vmatmul.mubr.msk.f32.vlgmr.msra.gmra.mrb[6].mxu1 %vm934_vm2, %v1092_v23 }
 0x5d9   : > { %4144 = vmatprep.mubr.msk.f32.mxu1 %vm4682_vm1, %v4683_v9 }
 0x64b   : > { %v1259_v27 = vpop.f32.mrb[4].mxu1 }
 0x64c   : > { %v4126_v29 = vpop.f32.mrb[5].mxu1  ;;  %4130 = vmatmul.mubr.msk.f32.vlgmr.msra.gmra.mrb[8].mxu0 %vm934_vm2, %v1259_v27 }
 0x64d   : > { %4138 = vmatpush3.xpose.msk.msra.mxu0 %vm934_vm2, %v1412_v28  ;;  %4139 = vmatprep.mubr.msk.f32.mxu0 %vm4682_vm1, %v4683_v9  ;;  %v1915_v28 = vld [vmem:[%s5546_s12 + $0x8] sm:$0xff]  ;;  %v1917_v29 = vld [vmem:[%s5546_s12 + $0x18] sm:$0xff] }
 0x64e   : > { %4147 = vmatprep.subr.mxu0 %v4683_v9 }
 0x650   : > { %4140 = vmatmul.mubr.msk.f32.vlgmr.msra.gmra.mrb[10].mxu0 %vm934_vm2, %v1410_v30  ;;  %v4375_v30 = vpack.c.bf16 %v1917_v29, %v1915_v28 }
 0x651   : > { %4149 = vmatprep.mubr.msk.f32.mxu0 %vm4682_vm1, %v4683_v9  ;;  %4148 = vmatpush3.msra.mxu0 %v931_v55  ;;  %v2021_v55 = vld [vmem:[%s5548_s14 + $0x28] sm:$0xff] }
 0x652   : > { %4157 = vmatprep.subr.mxu0 %v4683_v9 }
 0x6ab   : > { %v1405_v31 = vpop.f32.mrb[6].mxu1 }
 0x6ac   : > { %v4136_v32 = vpop.f32.mrb[7].mxu1 }
 0x71f   : > { %v1332_v33 = vpop.f32.mrb[8].mxu0 }
 0x720   : > { %v1406_v34 = vadd.f32 %v1405_v31, %v1332_v33  ;;  %v4131_v35 = vpop.f32.mrb[9].mxu0  ;;  %v1916_v31 = vld [vmem:[%s5546_s12 + $0x10] sm:$0xff]  ;;  %v1919_v33 = vld [vmem:[%s5546_s12 + $0x28] sm:$0xff] }
 0x723   : > { %v1483_v36 = vpop.f32.mrb[10].mxu0 }
 0x724   : > { %v1487_v37 = vsel %vm4985_vm3, %v1483_v36, -inf  ;;  %v4141_v38 = vpop.f32.mrb[11].mxu0  ;;  %v1918_v36 = vld [vmem:[%s5546_s12 + $0x20] sm:$0xff] }
 0x725   : > { %v1488_v39 = vsel %vm934_vm2, %v1487_v37, -inf }
 0x726   : > { %1489 = vmax.xlane.f32.xlu1 %v1488_v39 }
 0x737   : > { %1499 = vrot.lane.b32.xlu1 %v4969_v48, %s5566_s0  ;;  %s5598_s0 = smov 104  }
 0x73b   : > { %1649 = vrot.lane.b32.xlu1 %v4963_v47, %s5564_s28 }
 0x7b3   : > { %v1490_v40 = vpop.xlane.xlu1 %1489 }
 0x7b4   : > { %v1491_v41 = vsub.f32 %v1487_v37, %v1490_v40  ;;  %v1920_v37 = vld [vmem:[%s5546_s12 + $0x30] sm:$0xff] }
 0x7b5   : > { %v4381_v38 = vpack.c.bf16 %v1920_v37, %v1918_v36 }
 0x7b6   : > { %v1492_v42 = vmul.f32 1.442695, %v1491_v41 }
 0x7b7   : > { %v1500_v43 = vpop.permute.xlu1 %1499 }
 0x7b8   : > { %4577 = vpow2.f32 %v1492_v42  ;;  %4143 = vmatpush3.msra.mxu1 %v1500_v43  ;;  %v3863_v43 = vld [vmem:[%s5539_s5] ss:$0 sm:$0xff] }
 0x7b9   : > { %4152 = vmatprep.subr.mxu1 %v4683_v9 }
 0x7bb   : > { %v1650_v53 = vpop.permute.xlu1 %1649 }
 0x7c2   : > { %v4578_v44 = vpop.eup %4577 }
 0x7c3   : > { %v1494_v45 = vsel %vm934_vm2, %v4578_v44, 0.0 }
 0x7c4   : > { %1495 = vadd.xlane.f32.xlu0 %v1494_v45 }
 0x7da   : > { %1651 = vrot.lane.b32.xlu0 %v4957_v46, %s5564_s28 }
 0x851   : > { %v1496_v49 = vpop.xlane.xlu0 %1495 }
 0x852   : > { %4579 = vrcp.f32 %v1496_v49  ;;  %v2016_v49 = vld [vmem:[%s5548_s14] sm:$0xff] }
 0x855   : > { %v1652_v47 = vpop.permute.xlu0 %1651 }
 0x85c   : > { %v4580_v50 = vpop.eup %4579 }
 0x85d   : > { %v1498_v51 = vmul.f32 %v4580_v50, %v4578_v44  ;;  %v2017_v50 = vld [vmem:[%s5548_s14 + $0x8] sm:$0xff] }
 0x85f   : > { %4145 = vmatmul.mubr.msk.f32.vlgmr.msra.gmra.mrb[8].mxu1 %vm934_vm2, %v1498_v51  ;;  %v4384_v51 = vpack.c.bf16 %v2017_v50, %v2016_v49  ;;  %v3872_v49 = vld [vmem:[%s5540_s6 + $0x30] sm:$0xff]  ;;  %v3873_v50 = vld [vmem:[%s5540_s6 + $0x38] sm:$0xff] }
 0x860   : > { %4153 = vmatpush3.xpose.msk.msra.mxu1 %vm934_vm2, %v1652_v47  ;;  %4154 = vmatprep.mubr.msk.f32.mxu1 %vm4682_vm1, %v4683_v9 }
 0x861   : > { %4162 = vmatprep.subr.mxu1 %v4683_v9 }
 0x863   : > { %4155 = vmatmul.mubr.msk.f32.vlgmr.msra.gmra.mrb[10].mxu1 %vm934_vm2, %v1650_v53  ;;  %v2020_v53 = vld [vmem:[%s5548_s14 + $0x20] sm:$0xff] }
 0x864   : > { %4164 = vmatprep.mubr.msk.f32.mxu1 %vm4682_vm1, %v4683_v9  ;;  %4163 = vmatpush3.msra.mxu1 %v932_v4  ;;  %v2029_v4 = vld [vmem:[%s5548_s14 + $0x68] sm:$0xff] }
 0x865   : > { %4383 = vmatprep.subr.bf16.mxu1 %v4681_v6 }
 0x932   : > { %v1571_v56 = vpop.f32.mrb[8].mxu1 }
 0x933   : > { %v4146_v57 = vpop.f32.mrb[9].mxu1  ;;  %4150 = vmatmul.mubr.msk.f32.vlgmr.msra.gmra.mrb[12].mxu0 %vm934_vm2, %v1571_v56  ;;  %v4390_v56 = vpack.c.bf16 %v2021_v55, %v2020_v53 }
 0x934   : > { %4159 = vmatprep.mubr.msk.f32.mxu0 %vm4682_vm1, %v4683_v9  ;;  %v2022_v57 = vld [vmem:[%s5548_s14 + $0x30] sm:$0xff] }
 0x936   : > { %v1723_v58 = vpop.f32.mrb[10].mxu1 }
 0x937   : > { %v1727_v59 = vsel %vm4985_vm3, %v1723_v58, -inf  ;;  %v4156_v60 = vpop.f32.mrb[11].mxu1  ;;  %v2023_v58 = vld [vmem:[%s5548_s14 + $0x38] sm:$0xff] }
 0x938   : > { %v1728_v61 = vsel %vm934_vm2, %v1727_v59, -inf  ;;  %v2024_v60 = vld [vmem:[%s5548_s14 + $0x40] sm:$0xff] }
 0x939   : > { %1729 = vmax.xlane.f32.xlu1 %v1728_v61  ;;  %v2025_v61 = vld [vmem:[%s5548_s14 + $0x48] sm:$0xff] }
 0x9c6   : > { %v1730_v62 = vpop.xlane.xlu1 %1729 }
 0x9c7   : > { %v1731_v63 = vsub.f32 %v1727_v59, %v1730_v62  ;;  %v4393_v59 = vpack.c.bf16 %v2023_v58, %v2022_v57  ;;  %v4396_v62 = vpack.c.bf16 %v2025_v61, %v2024_v60  ;;  %v3880_v60 = vld [vmem:[%s5542_s8 + $0x38] sm:$0xff] }
 0x9c9   : > { %v1732_v1 = vmul.f32 1.442695, %v1731_v63  ;;  %v2026_v63 = vld [vmem:[%s5548_s14 + $0x50] sm:$0xff] }
 0x9cb   : > { %4581 = vpow2.f32 %v1732_v1  ;;  %v2027_v1 = vld [vmem:[%s5548_s14 + $0x58] sm:$0xff] }
 0x9d5   : > { %v4582_v2 = vpop.eup %4581 }
 0x9d6   : > { %v1734_v3 = vsel %vm934_vm2, %v4582_v2, 0.0 }
 0x9d7   : > { %1735 = vadd.xlane.f32.xlu0 %v1734_v3  ;;  %v2028_v3 = vld [vmem:[%s5548_s14 + $0x60] sm:$0xff] }
 0x9ed   : > { %1739 = vrot.lane.b32.xlu0 %v4969_v48, %s5564_s28  ;;  %s621_s28 = scalar_lea.vmem [#allocation2], %s3834_s1 }
 0x9ee   : > { %s3715_s23 = sshll.u32 %s621_s28, 4  ;;  %s5489_s23 = int_to_ptr.vmem [resolvable:$true] %s3715_s23 }
 0x9ef   : > { %s4617_s21 = scalar_lea.vmem %s5489_s23, 128 }
 0x9f0   : > { %p4618_p11 = scmp.ne.s32.totalorder %s5489_s23, %s4617_s21 }
 0x9f2   : > { %p4619_p12 = pnand %p4618_p11, %p4832_p5 }
 0x9f4   : > { %p4620_p13 = pneg %p4619_p12 }
 0xa06   : > { %v1644_v5 = vpop.f32.mrb[12].mxu0 }
 0xa07   : > { %v1648_v8 = vadd.f32 %v1644_v5, %v1406_v34  ;;  %v4151_v11 = vpop.f32.mrb[13].mxu0  ;;  %v1921_v34 = vld [vmem:[%s5546_s12 + $0x38] sm:$0xff]  ;;  %v4402_v5 = vpack.c.bf16 %v2029_v4, %v2028_v3 }
 0xa08   : > { %v4379_v35 = vpack.c.bf16 %v1921_v34, %v1919_v33  ;;  %v2031_v11 = vld [vmem:[%s5548_s14 + $0x78] sm:$0xff] }
 0xa64   : > { %v1736_v12 = vpop.xlane.xlu0 %1735 }
 0xa65   : > { %4583 = vrcp.f32 %v1736_v12 }
 0xa68   : > { %v1740_v13 = vpop.permute.xlu0 %1739 }
 0xa69   : > { %4158 = vmatpush3.msra.mxu0 %v1740_v13  ;;  %v1926_v13 = vsub.s32 0, %v4982_v52 }
 0xa6a   : > { %4376 = vmatprep.subr.bf16.mxu0 %v4375_v30 }
 0xa6f   : > { %v4584_v14 = vpop.eup %4583 }
 0xa70   : > { %v1738_v15 = vmul.f32 %v4584_v14, %v4582_v2  ;;  %v4399_v2 = vpack.c.bf16 %v2027_v1, %v2026_v63  ;;  %v1922_v14 = vld [vmem:[%s5547_s13] sm:$0x3] }
 0xa71   : > { %v3882_v1 = vld [vmem:[%s5543_s9 + $0x1] ss:$0 sm:$0xff] }
 0xa72   : > { %4160 = vmatmul.mubr.msk.f32.vlgmr.msra.gmra.mrb[14].mxu0 %vm934_vm2, %v1738_v15  ;;  %v1927_v15 = vrot.slane %v1922_v14, %v1926_v13 }
 0xa73   : > { %2001 = vmatprep.mubr.f32.mxu0 %v4683_v9 }
 0xb45   : > { %v1811_v16 = vpop.f32.mrb[14].mxu0 }
 0xb46   : > { %v4161_v17 = vpop.f32.mrb[15].mxu0  ;;  %4165 = vmatmul.mubr.msk.f32.vlgmr.msra.gmra.mrb[12].mxu1 %vm934_vm2, %v1811_v16 }
 0xb47   : > { %4199 = vmatprep.mubr.msk.f32.mxu1 %vm4682_vm1, %v4683_v9  ;;  %4385 = vmatpush3.bf16.msra.mxu1 %v4384_v51  ;;  %v4417_v51 = vpack.c.bf16 %v3873_v50, %v3872_v49 }
 0xb48   : > { %4386 = vmatprep.subr.bf16.mxu1 %v4681_v6 }
 0xc19   : > { %v1884_v18 = vpop.f32.mrb[12].mxu1 }
 0xc1a   : > { %v1888_v19 = vadd.f32 %v1884_v18, %v1648_v8  ;;  %v4166_v20 = vpop.f32.mrb[13].mxu1  ;;  %v2030_v8 = vld [vmem:[%s5548_s14 + $0x70] sm:$0xff] }
 0xc1b   : > { %v4405_v12 = vpack.c.bf16 %v2031_v11, %v2030_v8 }
 0xc1c   : > { %v1889_v22 = vadd.f32 %v1888_v19, %v4850_v0  ;;  %v1914_v0 = vld [vmem:[%s5546_s12] sm:$0xff] }
 0xc1d   : > { %v4377_v32 = vpack.c.bf16 %v1916_v31, %v1914_v0  ;;  %v3866_v31 = vld [vmem:[%s5549_s15] ss:$0 sm:$0xff] }
 0xc1e   : > { %v5074_v23 = vadd.f32 %v3862_v21, %v1889_v22  ;;  %v1930_v22 = vsub.s32 1, %v4982_v52  ;;  %v3613_v52 = vld [vmem:[%s5551_s17] sm:$0xff] }
 0xc1f   : > { %4378 = vmatpush1.bf16.msra.mxu0 %v4377_v32 }
 0xc20   : > { %v1899_v26 = vmul.f32 %v5074_v23, %v5074_v23  ;;  %4380 = vmatprep.subr.bf16.mxu0 %v4379_v35 }
 0xc22   : > { %v1900_v27 = vsel %vm659_vm0, %v1899_v26, 0.0  ;;  %v1931_v26 = vrot.slane %v1922_v14, %v1930_v22 }
 0xc23   : > { %1901 = vadd.xlane.f32.xlu1 %v1900_v27  ;;  %4382 = vmatpush1.bf16.msra.mxu0 %v4381_v38 }
 0xc24   : > { %4407 = vmatprep.subr.bf16.mxu0 %v4681_v6 }
 0xcb0   : > { %v1902_v39 = vpop.xlane.xlu1 %1901 }
 0xcb1   : > { %v1903_v40 = vmul.f32 0.03125, %v1902_v39 }
 0xcb3   : > { %v1904_v41 = vadd.f32 1e-05, %v1903_v40  ;;  %v3870_v40 = vld [vmem:[%s5540_s6 + $0x20] sm:$0xff] }
 0xcb5   : > { %4585 = vrsqrt.f32 %v1904_v41 }
 0xcbf   : > { %v4586_v42 = vpop.eup %4585 }
 0xcc0   : > { %v1906_v44 = vmul.f32 %v4586_v42, %v5074_v23  ;;  %v3868_v42 = vld [vmem:[%s5587_s27 + $0x1] ss:$0 sm:$0xff] }
 0xcc2   : > { %v1913_v45 = vmul.f32 %v3863_v43, %v1906_v44 }
 0xcc4   : > { %3864 = vmatmul.mubr.msk.f32.vlgmr.msra.gmra.mrb[16].mxu0 %vm659_vm0, %v1913_v45 }
 0xcc5   : > { %4409 = vmatpush3.bf16.msra.mxu0 %v4865_v7  ;;  %4210 = vmatprep.mubr.msk.f32.mxu0 %vm4682_vm1, %v4683_v9  ;;  %v2018_v7 = vld [vmem:[%s5548_s14 + $0x10] sm:$0xff] }
 0xcc6   : > { %4410 = vmatprep.subr.bf16.mxu0 %v4681_v6 }
 0xcc9   : > { %4412 = vmatpush3.bf16.msra.mxu0 %v4876_v10  ;;  %v2019_v10 = vld [vmem:[%s5548_s14 + $0x18] sm:$0xff] }
 0xcca   : > { %4413 = vmatprep.subr.bf16.mxu0 %v4681_v6  ;;  %v4387_v47 = vpack.c.bf16 %v2019_v10, %v2018_v7  ;;  %v3877_v7 = vld [vmem:[%s5542_s8 + $0x20] sm:$0xff]  ;;  %v3878_v10 = vld [vmem:[%s5542_s8 + $0x28] sm:$0xff] }
 0xccb   : > { %v4420_v57 = vpack.c.bf16 %v3878_v10, %v3877_v7 }
 0xccc   : > { %4388 = vmatpush3.bf16.msra.mxu1 %v4387_v47 }
 0xccd   : > { %4389 = vmatprep.subr.bf16.mxu1 %v4681_v6 }
 0xcd0   : > { %4391 = vmatpush3.bf16.msra.mxu1 %v4390_v56 }
 0xcd1   : > { %4392 = vmatprep.subr.bf16.mxu1 %v4681_v6 }
 0xcd4   : > { %4394 = vmatpush3.bf16.msra.mxu1 %v4393_v59  ;;  %v3879_v59 = vld [vmem:[%s5542_s8 + $0x30] sm:$0xff] }
 0xcd5   : > { %4395 = vmatprep.subr.bf16.mxu1 %v4681_v6  ;;  %v4423_v61 = vpack.c.bf16 %v3880_v60, %v3879_v59  ;;  %v3885_v60 = vld [vmem:[%s5544_s10 + $0x28] sm:$0xff] }
 0xcd8   : > { %4397 = vmatpush3.bf16.msra.mxu1 %v4396_v62 }
 0xcd9   : > { %4398 = vmatprep.subr.bf16.mxu1 %v4681_v6 }
 0xcdc   : > { %4400 = vmatpush3.bf16.msra.mxu1 %v4399_v2 }
 0xcdd   : > { %4401 = vmatprep.subr.bf16.mxu1 %v4681_v6 }
 0xce0   : > { %4403 = vmatpush3.bf16.msra.mxu1 %v4402_v5 }
 0xce1   : > { %4404 = vmatprep.subr.bf16.mxu1 %v4681_v6 }
 0xce4   : > { %4406 = vmatpush3.bf16.msra.mxu1 %v4405_v12 }
 0xce5   : > { %4429 = vmatprep.subr.bf16.mxu1 %v4681_v6 }
 0xd97   : > { %v2003_v16 = vpop.f32.mrb[16].mxu0 }
 0xd98   : > { %v2004_v17 = vadd.f32 %v2003_v16, %v1927_v15  ;;  %v2005_v18 = vpop.f32.mrb[17].mxu0 }
 0xd99   : > { %v2006_v29 = vadd.f32 %v2005_v18, %v1931_v26 }
 0xd9a   : > { %v3865_v19 = vmul.f32 -1.442695, %v2004_v17 }
 0xd9c   : > { %4587 = vpow2.f32 %v3865_v19 }
 0xda6   : > { %v4588_v20 = vpop.eup %4587 }
 0xda7   : > { %v2011_v21 = vadd.f32 1.0, %v4588_v20 }
 0xda9   : > { %4589 = vrcp.f32 %v2011_v21 }
 0xdb3   : > { %v4590_v27 = vpop.eup %4589 }
 0xdb4   : > { %v2014_v28 = vmul.f32 %v4590_v27, %v2004_v17 }
 0xdb6   : > { %v2015_v30 = vmul.f32 %v2014_v28, %v2006_v29 }
 0xdb8   : > { %4200 = vmatmul.mubr.f32.vlgmr.msra.gmra.mrb[14].mxu1 %v2015_v30 }
 0xdb9   : > { %4246 = vmatprep.mubr.msk.f32.mxu1 %vm4682_vm1, %v4683_v9 }
 0xe8b   : > { %v2098_v0 = vpop.f32.mrb[14].mxu1 }
 0xe8c   : > { %v2102_v32 = vadd.f32 %v2098_v0, %v5074_v23  ;;  %v4201_v33 = vpop.f32.mrb[15].mxu1  ;;  %v3871_v23 = vld [vmem:[%s5540_s6 + $0x28] sm:$0xff] }
 0xe8d   : > { %v4414_v44 = vpack.c.bf16 %v3871_v23, %v3870_v40 }
 0xe8e   : > { %v5186_v34 = vadd.f32 %v3866_v31, %v2102_v32 }
 0xe90   : > { %v2113_v35 = vmul.f32 %v5186_v34, %v5186_v34 }
 0xe92   : > { %v2114_v36 = vsel %vm659_vm0, %v2113_v35, 0.0 }
 0xe93   : > { %2115 = vadd.xlane.f32.xlu1 %v2114_v36 }
 0xf20   : > { %v2116_v37 = vpop.xlane.xlu1 %2115 }
 0xf21   : > { %v2117_v38 = vmul.f32 0.03125, %v2116_v37 }
 0xf23   : > { %v2118_v39 = vadd.f32 1e-05, %v2117_v38  ;;  %v3884_v38 = vld [vmem:[%s5544_s10 + $0x20] sm:$0xff] }
 0xf25   : > { %4591 = vrsqrt.f32 %v2118_v39 }
 0xf2f   : > { %v4592_v41 = vpop.eup %4591 }
 0xf30   : > { %v2120_v43 = vmul.f32 %v4592_v41, %v5186_v34 }
 0xf32   : > { %v2127_v45 = vmul.f32 %v3868_v42, %v2120_v43 }
 0xf34   : > { %4211 = vmatmul.mubr.msk.f32.vlgmr.msra.gmra.mrb[18].mxu0 %vm659_vm0, %v2127_v45  ;;  %v2128_v53 = vmul.f32 %v2127_v45, %v4905_v24  ;;  %v3875_v24 = vld [vmem:[%s5541_s7 + $0x1] ss:$0 sm:$0xff] }
 0xf35   : > { %4415 = vmatpush3.bf16.msra.mxu0 %v4414_v44  ;;  %4221 = vmatprep.mubr.msk.f32.mxu0 %vm4682_vm1, %v4683_v9 }
 0xf36   : > { %4416 = vmatprep.subr.bf16.mxu0 %v4681_v6 }
 0xf39   : > { %4418 = vmatpush3.bf16.msra.mxu0 %v4417_v51 }
 0xf3a   : > { %4419 = vmatprep.subr.bf16.mxu0 %v4681_v6 }
0x1007   : > { %v2198_v47 = vpop.f32.mrb[18].mxu0 }
0x1008   : > { %v2202_v55 = vmul.f32 %v2198_v47, %v4910_v25  ;;  %v4212_v56 = vpop.f32.mrb[19].mxu0 }
0x100a   : > { %v2203_v58 = vadd.f32 %v2202_v55, %v2128_v53 }
0x100c   : > { %4222 = vmatmul.mubr.msk.f32.vlgmr.msra.gmra.mrb[20].mxu0 %vm659_vm0, %v2203_v58 }
0x100d   : > { %4421 = vmatpush3.bf16.msra.mxu0 %v4420_v57  ;;  %4232 = vmatprep.mubr.msk.f32.mxu0 %vm4682_vm1, %v4683_v9 }
0x100e   : > { %4422 = vmatprep.subr.bf16.mxu0 %v4681_v6 }
0x1011   : > { %4424 = vmatpush3.bf16.msra.mxu0 %v4423_v61 }
0x1012   : > { %4425 = vmatprep.subr.bf16.mxu0 %v4681_v6 }
0x1014   : > { %4233 = vmatmul.mubr.msk.f32.vlgmr.msra.gmra.mrb[22].mxu0 %vm659_vm0, %v2127_v45 }
0x1015   : > { %4239 = vmatprep.mubr.msk.f32.mxu0 %vm4682_vm1, %v4683_v9 }
0x10df   : > { %v2286_v25 = vpop.f32.mrb[20].mxu0 }
0x10e0   : > { %v2287_v62 = vadd.f32 %v3875_v24, %v2286_v25  ;;  %v4223_v63 = vpop.f32.mrb[21].mxu0 }
0x10e2   : > { %2374 = vrot.lane.b32.xlu1 %v2287_v62, %s5593_s24  ;;  %v5259_v16 = vmul.f32 0.35355338, %v2287_v62  ;;  %s3944_s24 = sshll.u32 %s4815_s2, 7  ;;  %s4688_s2 = smov [#allocation2]  }
0x10e7   : > { %v2369_v2 = vpop.f32.mrb[22].mxu0 }
0x10e8   : > { %v2370_v3 = vadd.f32 %v3882_v1, %v2369_v2  ;;  %v4234_v4 = vpop.f32.mrb[23].mxu0 }
0x10ea   : > { %2378 = vst.msk [vmem:[%s4945_s3 + $0x8] sm:$0xff] %vm659_vm0, %v2370_v3 }
0x10f1   : > { %v2382_v5 = vld [vmem:[%s4945_s3 + $0x8] sm:$0xff]  ;;  %s5596_s3 = smov 120  }
0x10f2   : > { %v4430_v8 = vpack.c.bf16 %v2382_v5, %v4969_v48  ;;  %v5293_v44 = vpack.i.bf16 %v2382_v5, %v4969_v48 }
0x10f4   : > { %4431 = vmatpush3.bf16.msra.mxu1 %v4430_v8 }
0x10f5   : > { %4432 = vmatprep.subr.bf16.mxu1 %v4681_v6 }
0x1154   : > { %v2375_v11 = vpop.permute.xlu1 %2374 }
0x1155   : > { %2377 = vst.msk [vmem:[%s4952_s30 + $0x8] sm:$0xff] %vm659_vm0, %v2375_v11 }
0x115c   : > { %v2380_v12 = vld [vmem:[%s4952_s30 + $0x8] sm:$0xff]  ;;  %s3692_s30 = scalar_lea.sflag [#allocation3], %s619_s25 }
0x115d   : > { %v4426_v15 = vpack.c.bf16 %v2380_v12, %v4957_v46  ;;  %v4537_v21 = vpack.i.bf16 %v2380_v12, %v4957_v46 }
0x115f   : > { %4428 = vmatpush3.bf16.xpose.msk.msra.mxu0 %vm5251_vm4, %v4426_v15 }
0x1160   : > { %4436 = vmatprep.subr.bf16.mxu0 %v4681_v6 }
0x1166   : > { %4240 = vmatmul.mubr.msk.f32.vlgmr.msra.gmra.mrb[24].mxu0 %vm934_vm2, %v5259_v16 }
0x1167   : > { %4260 = vmatprep.mubr.msk.f32.mxu0 %vm4682_vm1, %v4683_v9 }
0x1239   : > { %v2464_v17 = vpop.f32.mrb[24].mxu0 }
0x123a   : > { %v2468_v18 = vsel %vm4985_vm3, %v2464_v17, -inf  ;;  %v4241_v19 = vpop.f32.mrb[25].mxu0 }
0x123b   : > { %v2470_v20 = vsel %vm2469_vm5, %v2468_v18, -inf }
0x123c   : > { %2471 = vmax.xlane.f32.xlu0 %v2470_v20 }
0x1252   : > { %4538 = vrot.lane.b32.xlu0 %v4537_v21, %s5596_s3 }
0x12c9   : > { %v2472_v26 = vpop.xlane.xlu0 %2471 }
0x12ca   : > { %v2473_v27 = vsub.f32 %v2468_v18, %v2472_v26 }
0x12cc   : > { %v2474_v28 = vmul.f32 1.442695, %v2473_v27 }
0x12cd   : > { %v4539_v31 = vpop.permute.xlu0 %4538 }
0x12ce   : > { %4593 = vpow2.f32 %v2474_v28  ;;  %v4541_v32 = vunpack.i.h.bf16 %v4539_v31  ;;  %v4540_v33 = vunpack.i.l.bf16 %v4539_v31 }
0x12d0   : > { %v4433_v36 = vpack.c.bf16 %v4541_v32, %v4540_v33 }
0x12d8   : > { %v4594_v29 = vpop.eup %4593 }
0x12d9   : > { %v2476_v30 = vsel %vm2469_vm5, %v4594_v29, 0.0 }
0x12da   : > { %2477 = vadd.xlane.f32.xlu1 %v2476_v30 }
0x12eb   : > { %2554 = vrot.lane.b32.xlu1 %v5259_v16, %s5596_s3 }
0x1367   : > { %v2478_v0 = vpop.xlane.xlu1 %2477 }
0x1368   : > { %4595 = vrcp.f32 %v2478_v0 }
0x136b   : > { %v2555_v37 = vpop.permute.xlu1 %2554 }
0x1372   : > { %v4596_v35 = vpop.eup %4595 }
0x1373   : > { %v2480_v46 = vmul.f32 %v4596_v35, %v4594_v29 }
0x1375   : > { %4247 = vmatmul.mubr.msk.f32.vlgmr.msra.gmra.mrb[16].mxu1 %vm2469_vm5, %v2480_v46 }
0x1376   : > { %4435 = vmatpush3.bf16.xpose.msk.msra.mxu1 %vm5251_vm4, %v4433_v36  ;;  %4253 = vmatprep.mubr.msk.f32.mxu1 %vm4682_vm1, %v4683_v9 }
0x1377   : > { %4268 = vmatprep.subr.mxu1 %v4683_v9 }
0x137d   : > { %4254 = vmatmul.mubr.msk.f32.vlgmr.msra.gmra.mrb[18].mxu1 %vm934_vm2, %v2555_v37 }
0x137e   : > { %4270 = vmatprep.mubr.msk.f32.mxu1 %vm4682_vm1, %v4683_v9  ;;  %4269 = vmatpush3.msra.mxu1 %v3884_v38 }
0x137f   : > { %4443 = vmatprep.subr.bf16.mxu1 %v4681_v6 }
0x1448   : > { %v2550_v39 = vpop.f32.mrb[16].mxu1 }
0x1449   : > { %v4248_v40 = vpop.f32.mrb[17].mxu1  ;;  %4271 = vmatmul.mubr.msk.f32.vlgmr.msra.gmra.mrb[20].mxu1 %vm934_vm2, %v2550_v39 }
0x144a   : > { %4284 = vmatprep.mubr.msk.f32.mxu1 %vm4682_vm1, %v4683_v9 }
0x1450   : > { %v2632_v23 = vpop.f32.mrb[18].mxu1 }
0x1451   : > { %v2636_v41 = vsel %vm4985_vm3, %v2632_v23, -inf  ;;  %v4255_v42 = vpop.f32.mrb[19].mxu1 }
0x1452   : > { %v2637_v43 = vsel %vm2469_vm5, %v2636_v41, -inf  ;;  %v3886_v42 = vld [vmem:[%s5544_s10 + $0x30] sm:$0xff] }
0x1453   : > { %2638 = vmax.xlane.f32.xlu0 %v2637_v43 }
0x1469   : > { %4543 = vrot.lane.b32.xlu0 %v5293_v44, %s5596_s3  ;;  %s5494_s3 = scalar_lea.hbm %s5552_s18, %s3944_s24 }
0x146d   : > { %2875 = vrot.lane.b32.xlu0 %v5259_v16, %s5597_s26 }
0x1471   : > { %4553 = vrot.lane.b32.xlu0 %v4537_v21, %s5598_s0 }
0x14e0   : > { %v2639_v45 = vpop.xlane.xlu0 %2638 }
0x14e1   : > { %v2640_v49 = vsub.f32 %v2636_v41, %v2639_v45 }
0x14e3   : > { %v2641_v50 = vmul.f32 1.442695, %v2640_v49 }
0x14e4   : > { %v4544_v51 = vpop.permute.xlu0 %4543 }
0x14e5   : > { %4597 = vpow2.f32 %v2641_v50  ;;  %v4546_v7 = vunpack.i.h.bf16 %v4544_v51  ;;  %v4545_v10 = vunpack.i.l.bf16 %v4544_v51 }
0x14e7   : > { %v4437_v47 = vpack.c.bf16 %v4546_v7, %v4545_v10 }
0x14e8   : > { %v2876_v24 = vpop.permute.xlu0 %2875 }
0x14e9   : > { %4438 = vmatpush3.bf16.msra.mxu0 %v4437_v47 }
0x14ea   : > { %4263 = vmatprep.subr.mxu0 %v4683_v9 }
0x14ec   : > { %v4554_v2 = vpop.permute.xlu0 %4553 }
0x14ed   : > { %v4556_v4 = vunpack.i.h.bf16 %v4554_v2  ;;  %v4555_v5 = vunpack.i.l.bf16 %v4554_v2  ;;  %v3913_v2 = vld [vmem:[%s5546_s12 + $0x48] sm:$0xff] }
0x14ef   : > { %v4598_v48 = vpop.eup %4597  ;;  %v4447_v8 = vpack.c.bf16 %v4556_v4, %v4555_v5  ;;  %v3914_v5 = vld [vmem:[%s5546_s12 + $0x50] sm:$0xff] }
0x14f0   : > { %v2643_v53 = vsel %vm2469_vm5, %v4598_v48, 0.0 }
0x14f1   : > { %2644 = vadd.xlane.f32.xlu1 %v2643_v53 }
0x1502   : > { %4548 = vrot.lane.b32.xlu1 %v4537_v21, %s5597_s26 }
0x1506   : > { %3122 = vrot.lane.b32.xlu1 %v5259_v16, %s5598_s0 }
0x151c   : > { %v2871_v55 = vpop.f32.mrb[20].mxu1 }
0x151d   : > { %v4272_v56 = vpop.f32.mrb[21].mxu1 }
0x157e   : > { %v2645_v57 = vpop.xlane.xlu1 %2644 }
0x157f   : > { %4599 = vrcp.f32 %v2645_v57 }
0x1582   : > { %v4549_v61 = vpop.permute.xlu1 %4548 }
0x1583   : > { %v4551_v25 = vunpack.i.h.bf16 %v4549_v61  ;;  %v4550_v62 = vunpack.i.l.bf16 %v4549_v61 }
0x1585   : > { %v4440_v63 = vpack.c.bf16 %v4551_v25, %v4550_v62 }
0x1586   : > { %v3123_v11 = vpop.permute.xlu1 %3122 }
0x1589   : > { %v4600_v58 = vpop.eup %4599 }
0x158a   : > { %v2647_v59 = vmul.f32 %v4600_v58, %v4598_v48  ;;  %v3887_v48 = vld [vmem:[%s5544_s10 + $0x38] sm:$0xff] }
0x158c   : > { %4261 = vmatmul.mubr.msk.f32.vlgmr.msra.gmra.mrb[26].mxu0 %vm2469_vm5, %v2647_v59 }
0x158d   : > { %4264 = vmatpush3.msra.mxu0 %v3885_v60  ;;  %4265 = vmatprep.mubr.msk.f32.mxu0 %vm4682_vm1, %v4683_v9 }
0x158e   : > { %4439 = vmatprep.subr.bf16.mxu0 %v4681_v6 }
0x165f   : > { %v2725_v1 = vpop.f32.mrb[26].mxu0 }
0x1660   : > { %v4262_v3 = vpop.f32.mrb[27].mxu0  ;;  %4266 = vmatmul.mubr.msk.f32.vlgmr.msra.gmra.mrb[28].mxu0 %vm934_vm2, %v2725_v1 }
0x1661   : > { %4442 = vmatpush3.bf16.xpose.msk.msra.mxu0 %vm5251_vm4, %v4440_v63  ;;  %4277 = vmatprep.mubr.msk.f32.mxu0 %vm4682_vm1, %v4683_v9  ;;  %v3915_v3 = vld [vmem:[%s5546_s12 + $0x58] sm:$0xff] }
0x1662   : > { %4446 = vmatprep.subr.bf16.mxu0 %v4681_v6  ;;  %v4453_v4 = vpack.c.bf16 %v3915_v3, %v3913_v2 }
0x1668   : > { %4278 = vmatmul.mubr.msk.f32.vlgmr.msra.gmra.mrb[30].mxu0 %vm934_vm2, %v2876_v24  ;;  %v3909_v24 = vld [vmem:[%s5545_s11 + $0x1] ss:$0 sm:$0xff] }
0x1669   : > { %4449 = vmatpush3.bf16.xpose.msk.msra.mxu0 %vm5251_vm4, %v4447_v8  ;;  %4296 = vmatprep.mubr.msk.f32.mxu0 %vm4682_vm1, %v4683_v9 }
0x166a   : > { %4454 = vmatprep.subr.bf16.mxu0 %v4453_v4 }
0x1670   : > { %4297 = vmatmul.mubr.msk.f32.vlgmr.msra.gmra.mrb[32].mxu0 %vm934_vm2, %v3123_v11  ;;  %v3917_v11 = vld [vmem:[%s5546_s12 + $0x68] sm:$0xff] }
0x1671   : > { %3485 = vmatprep.mubr.f32.mxu0 %v4683_v9 }
0x1733   : > { %v2798_v12 = vpop.f32.mrb[28].mxu0 }
0x1734   : > { %v5325_v15 = vadd.f32 %v2871_v55, %v2798_v12  ;;  %v4267_v16 = vpop.f32.mrb[29].mxu0  ;;  %v3919_v12 = vld [vmem:[%s5546_s12 + $0x78] sm:$0xff] }
0x1735   : > { %v3916_v16 = vld [vmem:[%s5546_s12 + $0x60] sm:$0xff] }
0x173b   : > { %v2953_v17 = vpop.f32.mrb[30].mxu0 }
0x173c   : > { %v2957_v18 = vsel %vm4985_vm3, %v2953_v17, -inf  ;;  %v4279_v19 = vpop.f32.mrb[31].mxu0  ;;  %v3918_v17 = vld [vmem:[%s5546_s12 + $0x70] sm:$0xff] }
0x173d   : > { %v2958_v14 = vsel %vm2469_vm5, %v2957_v18, -inf }
0x173e   : > { %2959 = vmax.xlane.f32.xlu0 %v2958_v14 }
0x1743   : > { %v3200_v20 = vpop.f32.mrb[32].mxu0 }
0x1744   : > { %v4298_v21 = vpop.f32.mrb[33].mxu0  ;;  %v3204_v35 = vsel %vm4985_vm3, %v3200_v20, -inf }
0x1745   : > { %v3205_v46 = vsel %vm2469_vm5, %v3204_v35, -inf }
0x1754   : > { %4558 = vrot.lane.b32.xlu0 %v5293_v44, %s5597_s26  ;;  %s4621_s26 = sshll.u32 %s4688_s2, 4  ;;  %s4622_s26 = int_to_ptr.vmem [resolvable:$false] %s4621_s26 }
0x1755   : > { %p4624_p0 = scmp.lt.s32.totalorder %s5489_s23, %s4622_s26 }
0x17cb   : > { %v2960_v26 = vpop.xlane.xlu0 %2959 }
0x17cc   : > { %v2961_v27 = vsub.f32 %v2957_v18, %v2960_v26  ;;  %v4459_v18 = vpack.c.bf16 %v3918_v17, %v3916_v16  ;;  %v3911_v26 = vld [vmem:[%s5539_s5 + $0x1] ss:$0 sm:$0xff] }
0x17ce   : > { %v2962_v28 = vmul.f32 1.442695, %v2961_v27 }
0x17cf   : > { %v4559_v29 = vpop.permute.xlu0 %4558 }
0x17d0   : > { %4601 = vpow2.f32 %v2962_v28  ;;  %v4561_v30 = vunpack.i.h.bf16 %v4559_v29  ;;  %v4560_v0 = vunpack.i.l.bf16 %v4559_v29  ;;  %v3923_v29 = vld [vmem:[%s5548_s14 + $0x80] sm:$0xff] }
0x17d2   : > { %v4444_v31 = vpack.c.bf16 %v4561_v30, %v4560_v0  ;;  %v3924_v30 = vld [vmem:[%s5548_s14 + $0x88] sm:$0xff] }
0x17d3   : > { %v4462_v0 = vpack.c.bf16 %v3924_v30, %v3923_v29 }
0x17d4   : > { %4445 = vmatpush3.bf16.msra.mxu1 %v4444_v31  ;;  %v3925_v31 = vld [vmem:[%s5548_s14 + $0x90] sm:$0xff] }
0x17d5   : > { %4287 = vmatprep.subr.mxu1 %v4683_v9 }
0x17da   : > { %v4602_v32 = vpop.eup %4601 }
0x17db   : > { %v2964_v33 = vsel %vm2469_vm5, %v4602_v32, 0.0 }
0x17dc   : > { %2965 = vadd.xlane.f32.xlu1 %v2964_v33  ;;  %v3927_v33 = vld [vmem:[%s5548_s14 + $0xa0] sm:$0xff] }
0x17e0   : > { %3206 = vmax.xlane.f32.xlu1 %v3205_v46 }
0x1869   : > { %v2966_v36 = vpop.xlane.xlu1 %2965 }
0x186a   : > { %4603 = vrcp.f32 %v2966_v36  ;;  %v3929_v36 = vld [vmem:[%s5548_s14 + $0xb0] sm:$0xff] }
0x186d   : > { %v3207_v37 = vpop.xlane.xlu1 %3206 }
0x186e   : > { %v3208_v38 = vsub.f32 %v3204_v35, %v3207_v37  ;;  %v3928_v35 = vld [vmem:[%s5548_s14 + $0xa8] sm:$0xff]  ;;  %v3930_v37 = vld [vmem:[%s5548_s14 + $0xb8] sm:$0xff] }
0x186f   : > { %v4468_v46 = vpack.c.bf16 %v3928_v35, %v3927_v33 }
0x1870   : > { %v3209_v39 = vmul.f32 1.442695, %v3208_v38  ;;  %v4471_v38 = vpack.c.bf16 %v3930_v37, %v3929_v36 }
0x1872   : > { %4605 = vpow2.f32 %v3209_v39  ;;  %v3931_v39 = vld [vmem:[%s5548_s14 + $0xc0] sm:$0xff] }
0x1874   : > { %v4604_v40 = vpop.eup %4603 }
0x1875   : > { %v2968_v23 = vmul.f32 %v4604_v40, %v4602_v32  ;;  %v3932_v40 = vld [vmem:[%s5548_s14 + $0xc8] sm:$0xff] }
0x1877   : > { %4285 = vmatmul.mubr.msk.f32.vlgmr.msra.gmra.mrb[22].mxu1 %vm2469_vm5, %v2968_v23  ;;  %v4474_v23 = vpack.c.bf16 %v3932_v40, %v3931_v39 }
0x1878   : > { %4289 = vmatprep.mubr.msk.f32.mxu1 %vm4682_vm1, %v4683_v9  ;;  %4288 = vmatpush3.msra.mxu1 %v3886_v42 }
0x1879   : > { %4450 = vmatprep.subr.bf16.mxu1 %v4681_v6 }
0x187c   : > { %v4606_v41 = vpop.eup %4605 }
0x187d   : > { %v3211_v54 = vsel %vm2469_vm5, %v4606_v41, 0.0 }
0x187e   : > { %3212 = vadd.xlane.f32.xlu1 %v3211_v54  ;;  %v3934_v54 = vld [vmem:[%s5548_s14 + $0xd8] sm:$0xff] }
0x188f   : > { %4563 = vrot.lane.b32.xlu1 %v5293_v44, %s5598_s0  ;;  %s4623_s0 = scalar_lea.vmem %s4622_s26, 256 }
0x1890   : > { %p4625_p1 = scmp.lt.s32.totalorder %s4623_s0, %s4617_s21 }
0x1892   : > { %p4626_p2 = por %p4625_p1, %p4624_p0 }
0x1894   : > { %p4627_p3 = pnand %p4626_p2, %p4620_p13 }
0x190b   : > { %v3213_v43 = vpop.xlane.xlu1 %3212 }
0x190c   : > { %4607 = vrcp.f32 %v3213_v43  ;;  %v3935_v43 = vld [vmem:[%s5548_s14 + $0xe0] sm:$0xff] }
0x190f   : > { %v4564_v45 = vpop.permute.xlu1 %4563 }
0x1910   : > { %v4566_v49 = vunpack.i.h.bf16 %v4564_v45  ;;  %v4565_v50 = vunpack.i.l.bf16 %v4564_v45  ;;  %v3936_v45 = vld [vmem:[%s5548_s14 + $0xe8] sm:$0xff] }
0x1912   : > { %v4451_v7 = vpack.c.bf16 %v4566_v49, %v4565_v50  ;;  %v4480_v49 = vpack.c.bf16 %v3936_v45, %v3935_v43  ;;  %v3937_v50 = vld [vmem:[%s5548_s14 + $0xf0] sm:$0xff] }
0x1916   : > { %v4608_v51 = vpop.eup %4607 }
0x1917   : > { %v3215_v44 = vmul.f32 %v4608_v51, %v4606_v41  ;;  %v3933_v41 = vld [vmem:[%s5548_s14 + $0xd0] sm:$0xff]  ;;  %v3938_v51 = vld [vmem:[%s5548_s14 + $0xf8] sm:$0xff] }
0x1918   : > { %v4477_v42 = vpack.c.bf16 %v3934_v54, %v3933_v41 }
0x194a   : > { %v3044_v10 = vpop.f32.mrb[22].mxu1 }
0x194b   : > { %v4286_v47 = vpop.f32.mrb[23].mxu1  ;;  %4290 = vmatmul.mubr.msk.f32.vlgmr.msra.gmra.mrb[24].mxu1 %vm934_vm2, %v3044_v10  ;;  %v3920_v10 = vld [vmem:[%s5547_s13 + $0x2] sm:$0x3] }
0x194c   : > { %4452 = vmatpush3.bf16.msra.mxu1 %v4451_v7  ;;  %4303 = vmatprep.mubr.msk.f32.mxu1 %vm4682_vm1, %v4683_v9  ;;  %v4483_v7 = vpack.c.bf16 %v3938_v51, %v3937_v50  ;;  %v3411_v47 = vrot.slane %v3920_v10, %v1926_v13  ;;  %v3940_v13 = vld [vmem:[%s5549_s15 + $0x1] ss:$0 sm:$0xff] }
0x194d   : > { %4306 = vmatprep.subr.mxu1 %v4683_v9 }
0x194f   : > { %4304 = vmatmul.mubr.msk.f32.vlgmr.msra.gmra.mrb[26].mxu1 %vm2469_vm5, %v3215_v44 }
0x1950   : > { %4308 = vmatprep.mubr.msk.f32.mxu1 %vm4682_vm1, %v4683_v9  ;;  %4307 = vmatpush3.msra.mxu1 %v3887_v48 }
0x1951   : > { %4461 = vmatprep.subr.bf16.mxu1 %v4681_v6 }
0x1a1e   : > { %v3117_v53 = vpop.f32.mrb[24].mxu1 }
0x1a1f   : > { %v3121_v55 = vadd.f32 %v3117_v53, %v5325_v15  ;;  %v4291_v56 = vpop.f32.mrb[25].mxu1  ;;  %v4457_v15 = vpack.c.bf16 %v3919_v12, %v3917_v11 }
0x1a22   : > { %v3291_v57 = vpop.f32.mrb[26].mxu1 }
0x1a23   : > { %v4305_v58 = vpop.f32.mrb[27].mxu1  ;;  %4309 = vmatmul.mubr.msk.f32.vlgmr.msra.gmra.mrb[28].mxu1 %vm934_vm2, %v3291_v57 }
0x1a24   : > { %4343 = vmatprep.mubr.msk.f32.mxu1 %vm4682_vm1, %v4683_v9  ;;  %4463 = vmatpush3.bf16.msra.mxu1 %v4462_v0  ;;  %v3415_v58 = vrot.slane %v3920_v10, %v1930_v22  ;;  %v3614_v22 = vld [vmem:[%s5551_s17 + $0x8] sm:$0xff] }
0x1a25   : > { %4464 = vmatprep.subr.bf16.mxu1 %v4681_v6 }
0x1af6   : > { %v3364_v59 = vpop.f32.mrb[28].mxu1 }
0x1af7   : > { %v3368_v60 = vadd.f32 %v3364_v59, %v3121_v55  ;;  %v4310_v61 = vpop.f32.mrb[29].mxu1 }
0x1af9   : > { %v3369_v25 = vadd.f32 %v3368_v60, %v5186_v34  ;;  %v3912_v34 = vld [vmem:[%s5546_s12 + $0x40] sm:$0xff] }
0x1afa   : > { %v4455_v8 = vpack.c.bf16 %v3914_v5, %v3912_v34  ;;  %v4486_v34 = vpack.c.bf16 %v3614_v22, %v3613_v52  ;;  %v3616_v5 = vld [vmem:[%s5551_s17 + $0x18] sm:$0xff] }
0x1afb   : > { %v5366_v62 = vadd.f32 %v3909_v24, %v3369_v25 }
0x1afc   : > { %4456 = vmatpush1.bf16.msra.mxu0 %v4455_v8 }
0x1afd   : > { %v3381_v63 = vmul.f32 %v5366_v62, %v5366_v62  ;;  %4458 = vmatprep.subr.bf16.mxu0 %v4457_v15 }
0x1aff   : > { %v3382_v1 = vsel %vm659_vm0, %v3381_v63, 0.0 }
0x1b00   : > { %3383 = vadd.xlane.f32.xlu0 %v3382_v1  ;;  %4460 = vmatpush1.bf16.msra.mxu0 %v4459_v18 }
0x1b01   : > { %4485 = vmatprep.subr.bf16.mxu0 %v4681_v6 }
0x1b8d   : > { %v3384_v19 = vpop.xlane.xlu0 %3383 }
0x1b8e   : > { %v3385_v14 = vmul.f32 0.03125, %v3384_v19 }
0x1b90   : > { %v3386_v20 = vadd.f32 1e-05, %v3385_v14 }
0x1b92   : > { %4609 = vrsqrt.f32 %v3386_v20 }
0x1b9c   : > { %v4610_v21 = vpop.eup %4609 }
0x1b9d   : > { %v3388_v27 = vmul.f32 %v4610_v21, %v5366_v62 }
0x1b9f   : > { %v3395_v28 = vmul.f32 %v3911_v26, %v3388_v27 }
0x1ba1   : > { %3921 = vmatmul.mubr.msk.f32.vlgmr.msra.gmra.mrb[34].mxu0 %vm659_vm0, %v3395_v28 }
0x1ba2   : > { %4354 = vmatprep.mubr.msk.f32.mxu0 %vm4682_vm1, %v4683_v9  ;;  %v3926_v9 = vld [vmem:[%s5548_s14 + $0x98] sm:$0xff]  ;;  %4487 = vmatpush3.bf16.msra.mxu0 %v4486_v34 }
0x1ba3   : > { %v4465_v32 = vpack.c.bf16 %v3926_v9, %v3925_v31  ;;  %4488 = vmatprep.subr.bf16.mxu0 %v4681_v6 }
0x1ba5   : > { %4466 = vmatpush3.bf16.msra.mxu1 %v4465_v32 }
0x1ba6   : > { %4467 = vmatprep.subr.bf16.mxu1 %v4681_v6 }
0x1ba9   : > { %4469 = vmatpush3.bf16.msra.mxu1 %v4468_v46 }
0x1baa   : > { %4470 = vmatprep.subr.bf16.mxu1 %v4681_v6 }
0x1bad   : > { %4472 = vmatpush3.bf16.msra.mxu1 %v4471_v38 }
0x1bae   : > { %4473 = vmatprep.subr.bf16.mxu1 %v4681_v6 }
0x1bb1   : > { %4475 = vmatpush3.bf16.msra.mxu1 %v4474_v23 }
0x1bb2   : > { %4476 = vmatprep.subr.bf16.mxu1 %v4681_v6 }
0x1bb5   : > { %4478 = vmatpush3.bf16.msra.mxu1 %v4477_v42 }
0x1bb6   : > { %4479 = vmatprep.subr.bf16.mxu1 %v4681_v6 }
0x1bb9   : > { %4481 = vmatpush3.bf16.msra.mxu1 %v4480_v49 }
0x1bba   : > { %4482 = vmatprep.subr.bf16.mxu1 %v4681_v6  ;;  %v3941_v6 = vld [vmem:[%s5550_s16] ss:$0 sm:$0xff] }
0x1bbd   : > { %4484 = vmatpush3.bf16.msra.mxu1 %v4483_v7 }
0x1c74   : > { %v3487_v44 = vpop.f32.mrb[34].mxu0 }
0x1c75   : > { %v3488_v48 = vadd.f32 %v3487_v44, %v3411_v47  ;;  %v3489_v53 = vpop.f32.mrb[35].mxu0 }
0x1c76   : > { %v3490_v61 = vadd.f32 %v3489_v53, %v3415_v58 }
0x1c77   : > { %v3922_v55 = vmul.f32 -1.442695, %v3488_v48 }
0x1c79   : > { %4611 = vpow2.f32 %v3922_v55 }
0x1c83   : > { %v4612_v56 = vpop.eup %4611 }
0x1c84   : > { %v3495_v57 = vadd.f32 1.0, %v4612_v56 }
0x1c86   : > { %4613 = vrcp.f32 %v3495_v57 }
0x1c90   : > { %v4614_v59 = vpop.eup %4613 }
0x1c91   : > { %v3498_v60 = vmul.f32 %v4614_v59, %v3488_v48 }
0x1c93   : > { %v3499_v24 = vmul.f32 %v3498_v60, %v3490_v61 }
0x1c95   : > { %4344 = vmatmul.mubr.f32.vlgmr.msra.gmra.mrb[30].mxu1 %v3499_v24 }
0x1d68   : > { %v3583_v25 = vpop.f32.mrb[30].mxu1 }
0x1d69   : > { %v3587_v63 = vadd.f32 %v3583_v25, %v5366_v62  ;;  %v4345_v1 = vpop.f32.mrb[31].mxu1  ;;  %v3615_v62 = vld [vmem:[%s5551_s17 + $0x10] sm:$0xff] }
0x1d6a   : > { %v4489_v8 = vpack.c.bf16 %v3616_v5, %v3615_v62 }
0x1d6b   : > { %v3596_v2 = vadd.f32 %v3940_v13, %v3587_v63 }
0x1d6c   : > { %4490 = vmatpush3.bf16.msra.mxu0 %v4489_v8 }
0x1d6d   : > { %v3598_v3 = vmul.f32 %v3596_v2, %v3596_v2 }
0x1d6f   : > { %v3599_v4 = vsel %vm659_vm0, %v3598_v3, 0.0 }
0x1d70   : > { %3600 = vadd.xlane.f32.xlu1 %v3599_v4 }
0x1dfd   : > { %v3601_v11 = vpop.xlane.xlu1 %3600 }
0x1dfe   : > { %v3602_v12 = vmul.f32 0.03125, %v3601_v11 }
0x1e00   : > { %v3603_v15 = vadd.f32 1e-05, %v3602_v12 }
0x1e02   : > { %4615 = vrsqrt.f32 %v3603_v15 }
0x1e0c   : > { %v4616_v16 = vpop.eup %4615 }
0x1e0d   : > { %v3605_v17 = vmul.f32 %v4616_v16, %v3596_v2 }
0x1e0f   : > { %v3612_v18 = vmul.f32 %v3941_v6, %v3605_v17 }
0x1e11   : > { %4355 = vmatmul.mubr.msk.f32.vlgmr.msra.gmra.mrb[36].mxu0 %vm659_vm0, %v3612_v18 }
0x1ee4   : > { %v3686_v19 = vpop.f32.mrb[36].mxu0 }
0x1ee5   : > { %3690 = vst [vmem:[%s621_s28] sm:$0xff] %v3686_v19  ;;  %v4356_v14 = vpop.f32.mrb[37].mxu0 }
0x1ee6   : > { %4630 = shalt.err (!%p4627_p3)
}
0x1ee7   : > { %s4631_s25 = scalar_lea.hbm %s5494_s3, 128  ;;  %s4635_s24 = scalar_lea.hbm %s5552_s18, 256 }
0x1ee8   : > { %p4632_p4 = scmp.ne.s32.totalorder %s5494_s3, %s4631_s25  ;;  %p4636_p9 = scmp.lt.u32.totalorder %s5494_s3, %s5552_s18 }
0x1ee9   : > { %p4637_p10 = scmp.lt.u32.totalorder %s4635_s24, %s4631_s25  ;;  %p4639_p12 = scmp.lt.u32.totalorder %s4631_s25, %s5494_s3 }
0x1eea   : > { %p4633_p7 = pnand %p4632_p4, %p4832_p5 }
0x1eeb   : > { %p4638_p11 = por %p4637_p10, %p4636_p9 }
0x1eec   : > { %p4634_p8 = pneg %p4633_p7 }
0x1eed   : > { %p4640_p13 = por %p4639_p12, %p4638_p11 }
0x1eef   : > { %p4641_p0 = pnand %p4640_p13, %p4634_p8 }
0x1ef1   : > { %4644 = shalt.err (!%p4641_p0)
}
0x1ef2   : > { %4491 = dma.vmem_to_hbm [thread:$0]  (%p4832_p5), %s5489_s23, 128, %s5494_s3, %s3692_s30  }
0x1ef3 PF: > { %s5599_s21 = sld [smem:[#allocation7_spill]]  ;;  %s5600_s2 = sld [smem:[#allocation5_spill]] }
0x1ef9   : > { %p4497_p1 = scmp.ge.s32.totalorder %s5599_s21, 2  ;;  %s3733_s0 = sand.u32 1, %s5600_s2  }
0x1efa   : > { %s3734_s1 = scalar_lea.sflag [#allocation3], %s3733_s0 }
0x1efb   : > { %p4494_p2 = pnand %p4497_p1, %p4836_p6 }
0x1efd   : > { %4662 = dma.done.wait (!%p4494_p2), %s3734_s1, 128  }
0x1efe   : > { %4664 = vsyncadd (!%p4494_p2), %s3734_s1, 4294967168  ;;  %s5602_s24 = sld [smem:[#allocation8_spill]]  ;;  %s5603_s25 = sld [smem:[#allocation6_spill]] }
0x1eff   : > { %s5604_s23 = sld [smem:[#allocation9_spill]]  ;;  %s5605_s1 = smov %s4671_s22 }
0x1f04   : > { %p31_p3 = scmp.ge.s32.totalorder %s5602_s24, 4   ;;  %s5606_s22 = smov %s5603_s25 }
0x1f06   :  { %33 = sbr.rel (!%p31_p3) target bundleno = 10 (0xa), region = 163 }
0x1f0d   :  { %3755 = vsyncpa [#allocation3], 1 }
0x1f0e   :  { %3757 = vsyncpa [#allocation3 + $0x1], 1 }

</bundles_post_ra>
